<compile_context>
chip_gen: v7x
topology: tpu7x:2x2x1
jax: 0.10.0
libtpu: 0.0.40
codegen_flags: <defaults>
</compile_context>

<pallas_src>
import jax
import jax.numpy as jnp
import numpy as np
from jax.experimental import pallas as pl
from jax.experimental.pallas import tpu as pltpu  # noqa: F401  (TPU backend)


def encoder_gru_kernel(x_ref,     # (T, HP)   bf16  pre-gathered embedding rows
                       h0_ref,    # (1, HP)   f32   initial hidden
                       w_ih_ref,  # (HP, 3HP) bf16  packed input weights  (r|z|n blocks)
                       b_in_ref,  # (1, 3HP)  f32   b_ih (+ b_hh for r,z blocks)
                       w_hh_ref,  # (HP, 3HP) bf16  packed hidden weights (r|z|n blocks)
                       b_hn_ref,  # (1, HP)   f32   b_hh_n (must stay inside r*(...))
                       out_ref):  # (T, HP)   f32   per-step hidden states
    T, HP = out_ref.shape

    # ---- one batched MXU push for ALL input-side projections ---------------
    gi = jnp.dot(x_ref[...], w_ih_ref[...],
                 preferred_element_type=jnp.float32) + b_in_ref[...]       # (T, 3HP) f32

    b_hn = b_hn_ref[...]                                                   # (1, HP) f32
    h = h0_ref[...]                                                        # (1, HP) f32

    # ---- serial recurrence: fully unrolled, h stays in vregs ----------------
    outs = []
    for t in range(T):                       # T is static & small -> unrolled
        gh = jnp.dot(h.astype(jnp.bfloat16), w_hh_ref[...],
                     preferred_element_type=jnp.float32)                   # (1, 3HP) f32
        # 128-lane-aligned gate slices (no cross-lane shuffles)
        r = jax.nn.sigmoid(gi[t:t + 1, 0:HP] + gh[:, 0:HP])
        z = jax.nn.sigmoid(gi[t:t + 1, HP:2 * HP] + gh[:, HP:2 * HP])
        n = jnp.tanh(gi[t:t + 1, 2 * HP:] + r * (gh[:, 2 * HP:] + b_hn))
        h = (1.0 - z) * n + z * h                                          # f32 update
        outs.append(h)

    # single full writeback of the whole (T, HP) slab (no per-step masked stores)
    out_ref[...] = jnp.concatenate(outs, axis=0).astype(out_ref.dtype)


def encoder_rnn_forward(tokens, hidden, params):
    """Run EncoderRNN over a token sequence in one fused pallas_call.

    tokens: (T,) int32; hidden: (1, 1, H) f32.
    Returns (outputs (T, 1, H), new_hidden (1, 1, H)).  With T == 1 this is
    exactly the PyTorch module's forward (output == new hidden).
    """
    H, HP = params["H"], params["HP"]
    T = int(tokens.shape[0])
    tokens = tokens.astype(jnp.int32)

    # Embedding gather in the wrapper: only the T needed rows (bf16) enter the
    # kernel, so the table never has to live in VMEM and no table bytes are
    # wasted on rows we don't read.  (Note: XLA gather clamps OOB ids, whereas
    # nn.Embedding would raise -- semantic divergence only for invalid inputs.)
    x_pad = params["emb_pad"][tokens]                                      # (T, HP) bf16
    h0_pad = jnp.zeros((1, HP), jnp.float32).at[:, :H].set(hidden.reshape(1, H))

    # No grid: everything is tiny and resident; whole arrays land in VMEM.
    out_pad = pl.pallas_call(
        encoder_gru_kernel,
        out_shape=jax.ShapeDtypeStruct((T, HP), jnp.float32),
    )(x_pad, h0_pad, params["w_ih_pack"], params["b_in_pack"],
      params["w_hh_pack"], params["b_hn_pack"])

    out = out_pad[:, :H]                       # strip lane padding
    outputs = out.reshape(T, 1, H)
    new_hidden = out[T - 1].reshape(1, 1, H)   # GRU output == new hidden
    return outputs, new_hidden


def make_params(key, input_size, hidden_size):
    """PyTorch-style init + packed/padded kernel parameters (gate order r, z, n)."""
    H, V = hidden_size, input_size
    HP = ((H + 127) // 128) * 128              # pad each gate to a 128-lane block
    k_emb, k_wih, k_whh, k_bih, k_bhh = jax.random.split(key, 5)
    bound = 1.0 / np.sqrt(H)
    emb = jax.random.normal(k_emb, (V, H), jnp.float32)                     # nn.Embedding ~ N(0,1)
    w_ih = jax.random.uniform(k_wih, (3 * H, H), jnp.float32, -bound, bound)
    w_hh = jax.random.uniform(k_whh, (3 * H, H), jnp.float32, -bound, bound)
    b_ih = jax.random.uniform(k_bih, (3 * H,), jnp.float32, -bound, bound)
    b_hh = jax.random.uniform(k_bhh, (3 * H,), jnp.float32, -bound, bound)

    w_ih_t, w_hh_t = w_ih.T, w_hh.T            # (H, 3H) so the kernel computes x @ W

    # bf16 embedding: halves gather/DMA bytes; matmul consumes bf16 anyway.
    emb_pad = jnp.zeros((V, HP), jnp.float32).at[:, :H].set(emb).astype(jnp.bfloat16)

    def pack_w(w_t):  # (H, 3H) -> (HP, 3HP); each gate in its own 128-lane block
        out = jnp.zeros((HP, 3 * HP), jnp.float32)
        for g in range(3):
            out = out.at[0:H, g * HP:g * HP + H].set(w_t[:, g * H:(g + 1) * H])
        return out

    w_ih_pack = pack_w(w_ih_t).astype(jnp.bfloat16)
    w_hh_pack = pack_w(w_hh_t).astype(jnp.bfloat16)

    # Input-side bias: fold b_hh_r / b_hh_z in (the r/z gate sums are symmetric);
    # only b_hh_n must stay recurrent-side because r multiplies (h@W_hn + b_hn).
    b_in_pack = jnp.zeros((1, 3 * HP), jnp.float32)
    b_in_pack = b_in_pack.at[0, 0:H].set(b_ih[0:H] + b_hh[0:H])
    b_in_pack = b_in_pack.at[0, HP:HP + H].set(b_ih[H:2 * H] + b_hh[H:2 * H])
    b_in_pack = b_in_pack.at[0, 2 * HP:2 * HP + H].set(b_ih[2 * H:3 * H])
    b_hn_pack = jnp.zeros((1, HP), jnp.float32).at[0, 0:H].set(b_hh[2 * H:3 * H])

    return {
        "H": H, "HP": HP,
        # logical params (reference)
        "embedding": emb, "w_ih_t": w_ih_t, "w_hh_t": w_hh_t,
        "b_ih": b_ih, "b_hh": b_hh,
        # packed kernel params
        "emb_pad": emb_pad,
        "w_ih_pack": w_ih_pack, "b_in_pack": b_in_pack,
        "w_hh_pack": w_hh_pack, "b_hn_pack": b_hn_pack,
    }


def reference_forward(tokens, hidden, params):
    """Pure-JAX torch.nn.GRU reference (unpadded), same precision policy as the
    kernel: bf16 matmul inputs, f32 accumulation and f32 gate math."""
    H = params["H"]
    emb = params["embedding"]
    w_ih_bf = params["w_ih_t"].astype(jnp.bfloat16)
    w_hh_bf = params["w_hh_t"].astype(jnp.bfloat16)
    b_ih = params["b_ih"].reshape(1, 3 * H)
    b_hh = params["b_hh"].reshape(1, 3 * H)

    h = hidden.reshape(1, H).astype(jnp.float32)
    outs = []
    for t in range(int(tokens.shape[0])):
        x_bf = emb[tokens[t]].reshape(1, H).astype(jnp.bfloat16)
        h_bf = h.astype(jnp.bfloat16)
        gi = jnp.dot(x_bf, w_ih_bf, preferred_element_type=jnp.float32) + b_ih
        gh = jnp.dot(h_bf, w_hh_bf, preferred_element_type=jnp.float32) + b_hh
        r = jax.nn.sigmoid(gi[:, :H] + gh[:, :H])
        z = jax.nn.sigmoid(gi[:, H:2 * H] + gh[:, H:2 * H])
        n = jnp.tanh(gi[:, 2 * H:] + r * gh[:, 2 * H:])
        h = (1.0 - z) * n + z * h
        outs.append(h)
    return jnp.stack(outs, axis=0), h.reshape(1, 1, H)


if __name__ == "__main__":
    VOCAB = 16     # input_size
    HIDDEN = 32    # hidden_size
    SEQ = 8        # number of encoder time steps fused into one pallas_call

    key = jax.random.PRNGKey(0)
    k_params, k_tok, k_hid = jax.random.split(key, 3)

    params = make_params(k_params, VOCAB, HIDDEN)
    tokens = jax.random.randint(k_tok, (SEQ,), 0, VOCAB, dtype=jnp.int32)
    hidden0 = jax.random.normal(k_hid, (1, 1, HIDDEN), jnp.float32)

    # Fused multi-step run (equivalent to calling EncoderRNN.forward SEQ times).
    outputs, hidden = encoder_rnn_forward(tokens, hidden0, params)
    outputs = jax.block_until_ready(outputs)
    hidden = jax.block_until_ready(hidden)

    ref_outputs, ref_hidden = reference_forward(tokens, hidden0, params)
    assert outputs.shape == (SEQ, 1, HIDDEN) and hidden.shape == (1, 1, HIDDEN)
    # tolerance covers bf16 matmul inputs + fused-vs-split f32 accumulation order
    np.testing.assert_allclose(np.asarray(outputs), np.asarray(ref_outputs),
                               rtol=2e-3, atol=2e-3)
    np.testing.assert_allclose(np.asarray(hidden), np.asarray(ref_hidden),
                               rtol=2e-3, atol=2e-3)

    # Single-step call: exactly the PyTorch module's forward shapes/semantics.
    out1, h1 = encoder_rnn_forward(tokens[:1], hidden0, params)
    out1 = jax.block_until_ready(out1)
    assert out1.shape == (1, 1, HIDDEN) and h1.shape == (1, 1, HIDDEN)
    np.testing.assert_allclose(np.asarray(out1), np.asarray(ref_outputs[:1]),
                               rtol=2e-3, atol=2e-3)
    np.testing.assert_allclose(np.asarray(h1), np.asarray(ref_outputs[0]).reshape(1, 1, HIDDEN),
                               rtol=2e-3, atol=2e-3)

    print("KERNEL_OK")
</pallas_src>

<mosaic_0001>
module attributes {stable_mosaic.version = 11 : i64} {
  func.func @encoder_gru_kernel(%arg0: memref<8x128xbf16, #tpu.memory_space<vmem>>, %arg1: memref<1x128xf32, #tpu.memory_space<vmem>>, %arg2: memref<128x384xbf16, #tpu.memory_space<vmem>>, %arg3: memref<1x384xf32, #tpu.memory_space<vmem>>, %arg4: memref<128x384xbf16, #tpu.memory_space<vmem>>, %arg5: memref<1x128xf32, #tpu.memory_space<vmem>>, %arg6: memref<8x128xf32, #tpu.memory_space<vmem>>) attributes {dimension_semantics = [], scalar_prefetch = 0 : i64, scratch_operands = 0 : i64, tpu.core_type = #tpu.core_type<tc>} {
    %c0 = arith.constant 0 : index
    %c0_0 = arith.constant 0 : index
    %0 = vector.load %arg0[%c0, %c0_0] : memref<8x128xbf16, #tpu.memory_space<vmem>>, vector<8x128xbf16>
    %c0_1 = arith.constant 0 : index
    %c0_2 = arith.constant 0 : index
    %1 = vector.load %arg2[%c0_1, %c0_2] : memref<128x384xbf16, #tpu.memory_space<vmem>>, vector<128x384xbf16>
    %cst = arith.constant dense<0.000000e+00> : vector<8x384xf32>
    %2 = tpu.matmul %0, %1, %cst {dimension_numbers = #tpu.dot_dimension_numbers<[1], [0], [0], [1], [0, 0, 1, 1], [], []>} : vector<8x128xbf16>, vector<128x384xbf16>, vector<8x384xf32> -> vector<8x384xf32>
    %c0_3 = arith.constant 0 : index
    %c0_4 = arith.constant 0 : index
    %3 = vector.load %arg3[%c0_3, %c0_4] : memref<1x384xf32, #tpu.memory_space<vmem>>, vector<1x384xf32>
    %4 = vector.broadcast %3 : vector<1x384xf32> to vector<8x384xf32>
    %5 = arith.addf %2, %4 : vector<8x384xf32>
    %c0_5 = arith.constant 0 : index
    %c0_6 = arith.constant 0 : index
    %6 = vector.load %arg5[%c0_5, %c0_6] : memref<1x128xf32, #tpu.memory_space<vmem>>, vector<1x128xf32>
    %c0_7 = arith.constant 0 : index
    %c0_8 = arith.constant 0 : index
    %7 = vector.load %arg1[%c0_7, %c0_8] : memref<1x128xf32, #tpu.memory_space<vmem>>, vector<1x128xf32>
    %8 = arith.truncf %7 : vector<1x128xf32> to vector<1x128xbf16>
    %c0_9 = arith.constant 0 : index
    %c0_10 = arith.constant 0 : index
    %9 = vector.load %arg4[%c0_9, %c0_10] : memref<128x384xbf16, #tpu.memory_space<vmem>>, vector<128x384xbf16>
    %cst_11 = arith.constant dense<0.000000e+00> : vector<1x384xf32>
    %10 = tpu.matmul %8, %9, %cst_11 {dimension_numbers = #tpu.dot_dimension_numbers<[1], [0], [0], [1], [0, 0, 1, 1], [], []>} : vector<1x128xbf16>, vector<128x384xbf16>, vector<1x384xf32> -> vector<1x384xf32>
    %11 = vector.extract_strided_slice %5 {offsets = [0, 0], sizes = [1, 128], strides = [1, 1]} : vector<8x384xf32> to vector<1x128xf32>
    %12 = vector.extract_strided_slice %10 {offsets = [0, 0], sizes = [1, 128], strides = [1, 1]} : vector<1x384xf32> to vector<1x128xf32>
    %13 = arith.addf %11, %12 : vector<1x128xf32>
    %14 = arith.negf %13 : vector<1x128xf32>
    %15 = math.exp %14 : vector<1x128xf32>
    %cst_12 = arith.constant 1.000000e+00 : f32
    %16 = vector.broadcast %cst_12 : f32 to vector<1x128xf32>
    %17 = arith.addf %16, %15 : vector<1x128xf32>
    %18 = arith.divf %16, %17 : vector<1x128xf32>
    %19 = vector.extract_strided_slice %5 {offsets = [0, 128], sizes = [1, 128], strides = [1, 1]} : vector<8x384xf32> to vector<1x128xf32>
    %20 = vector.extract_strided_slice %10 {offsets = [0, 128], sizes = [1, 128], strides = [1, 1]} : vector<1x384xf32> to vector<1x128xf32>
    %21 = arith.addf %19, %20 : vector<1x128xf32>
    %22 = arith.negf %21 : vector<1x128xf32>
    %23 = math.exp %22 : vector<1x128xf32>
    %cst_13 = arith.constant 1.000000e+00 : f32
    %24 = vector.broadcast %cst_13 : f32 to vector<1x128xf32>
    %25 = arith.addf %24, %23 : vector<1x128xf32>
    %26 = arith.divf %24, %25 : vector<1x128xf32>
    %27 = vector.extract_strided_slice %5 {offsets = [0, 256], sizes = [1, 128], strides = [1, 1]} : vector<8x384xf32> to vector<1x128xf32>
    %28 = vector.extract_strided_slice %10 {offsets = [0, 256], sizes = [1, 128], strides = [1, 1]} : vector<1x384xf32> to vector<1x128xf32>
    %29 = arith.addf %28, %6 : vector<1x128xf32>
    %30 = arith.mulf %18, %29 : vector<1x128xf32>
    %31 = arith.addf %27, %30 : vector<1x128xf32>
    %32 = math.tanh %31 : vector<1x128xf32>
    %cst_14 = arith.constant 1.000000e+00 : f32
    %33 = vector.broadcast %cst_14 : f32 to vector<1x128xf32>
    %34 = arith.subf %33, %26 : vector<1x128xf32>
    %35 = arith.mulf %34, %32 : vector<1x128xf32>
    %36 = arith.mulf %26, %7 : vector<1x128xf32>
    %37 = arith.addf %35, %36 : vector<1x128xf32>
    %38 = arith.truncf %37 : vector<1x128xf32> to vector<1x128xbf16>
    %c0_15 = arith.constant 0 : index
    %c0_16 = arith.constant 0 : index
    %39 = vector.load %arg4[%c0_15, %c0_16] : memref<128x384xbf16, #tpu.memory_space<vmem>>, vector<128x384xbf16>
    %cst_17 = arith.constant dense<0.000000e+00> : vector<1x384xf32>
    %40 = tpu.matmul %38, %39, %cst_17 {dimension_numbers = #tpu.dot_dimension_numbers<[1], [0], [0], [1], [0, 0, 1, 1], [], []>} : vector<1x128xbf16>, vector<128x384xbf16>, vector<1x384xf32> -> vector<1x384xf32>
    %41 = vector.extract_strided_slice %5 {offsets = [1, 0], sizes = [1, 128], strides = [1, 1]} : vector<8x384xf32> to vector<1x128xf32>
    %42 = vector.extract_strided_slice %40 {offsets = [0, 0], sizes = [1, 128], strides = [1, 1]} : vector<1x384xf32> to vector<1x128xf32>
    %43 = arith.addf %41, %42 : vector<1x128xf32>
    %44 = arith.negf %43 : vector<1x128xf32>
    %45 = math.exp %44 : vector<1x128xf32>
    %cst_18 = arith.constant 1.000000e+00 : f32
    %46 = vector.broadcast %cst_18 : f32 to vector<1x128xf32>
    %47 = arith.addf %46, %45 : vector<1x128xf32>
    %48 = arith.divf %46, %47 : vector<1x128xf32>
    %49 = vector.extract_strided_slice %5 {offsets = [1, 128], sizes = [1, 128], strides = [1, 1]} : vector<8x384xf32> to vector<1x128xf32>
    %50 = vector.extract_strided_slice %40 {offsets = [0, 128], sizes = [1, 128], strides = [1, 1]} : vector<1x384xf32> to vector<1x128xf32>
    %51 = arith.addf %49, %50 : vector<1x128xf32>
    %52 = arith.negf %51 : vector<1x128xf32>
    %53 = math.exp %52 : vector<1x128xf32>
    %cst_19 = arith.constant 1.000000e+00 : f32
    %54 = vector.broadcast %cst_19 : f32 to vector<1x128xf32>
    %55 = arith.addf %54, %53 : vector<1x128xf32>
    %56 = arith.divf %54, %55 : vector<1x128xf32>
    %57 = vector.extract_strided_slice %5 {offsets = [1, 256], sizes = [1, 128], strides = [1, 1]} : vector<8x384xf32> to vector<1x128xf32>
    %58 = vector.extract_strided_slice %40 {offsets = [0, 256], sizes = [1, 128], strides = [1, 1]} : vector<1x384xf32> to vector<1x128xf32>
    %59 = arith.addf %58, %6 : vector<1x128xf32>
    %60 = arith.mulf %48, %59 : vector<1x128xf32>
    %61 = arith.addf %57, %60 : vector<1x128xf32>
    %62 = math.tanh %61 : vector<1x128xf32>
    %cst_20 = arith.constant 1.000000e+00 : f32
    %63 = vector.broadcast %cst_20 : f32 to vector<1x128xf32>
    %64 = arith.subf %63, %56 : vector<1x128xf32>
    %65 = arith.mulf %64, %62 : vector<1x128xf32>
    %66 = arith.mulf %56, %37 : vector<1x128xf32>
    %67 = arith.addf %65, %66 : vector<1x128xf32>
    %68 = arith.truncf %67 : vector<1x128xf32> to vector<1x128xbf16>
    %c0_21 = arith.constant 0 : index
    %c0_22 = arith.constant 0 : index
    %69 = vector.load %arg4[%c0_21, %c0_22] : memref<128x384xbf16, #tpu.memory_space<vmem>>, vector<128x384xbf16>
    %cst_23 = arith.constant dense<0.000000e+00> : vector<1x384xf32>
    %70 = tpu.matmul %68, %69, %cst_23 {dimension_numbers = #tpu.dot_dimension_numbers<[1], [0], [0], [1], [0, 0, 1, 1], [], []>} : vector<1x128xbf16>, vector<128x384xbf16>, vector<1x384xf32> -> vector<1x384xf32>
    %71 = vector.extract_strided_slice %5 {offsets = [2, 0], sizes = [1, 128], strides = [1, 1]} : vector<8x384xf32> to vector<1x128xf32>
    %72 = vector.extract_strided_slice %70 {offsets = [0, 0], sizes = [1, 128], strides = [1, 1]} : vector<1x384xf32> to vector<1x128xf32>
    %73 = arith.addf %71, %72 : vector<1x128xf32>
    %74 = arith.negf %73 : vector<1x128xf32>
    %75 = math.exp %74 : vector<1x128xf32>
    %cst_24 = arith.constant 1.000000e+00 : f32
    %76 = vector.broadcast %cst_24 : f32 to vector<1x128xf32>
    %77 = arith.addf %76, %75 : vector<1x128xf32>
    %78 = arith.divf %76, %77 : vector<1x128xf32>
    %79 = vector.extract_strided_slice %5 {offsets = [2, 128], sizes = [1, 128], strides = [1, 1]} : vector<8x384xf32> to vector<1x128xf32>
    %80 = vector.extract_strided_slice %70 {offsets = [0, 128], sizes = [1, 128], strides = [1, 1]} : vector<1x384xf32> to vector<1x128xf32>
    %81 = arith.addf %79, %80 : vector<1x128xf32>
    %82 = arith.negf %81 : vector<1x128xf32>
    %83 = math.exp %82 : vector<1x128xf32>
    %cst_25 = arith.constant 1.000000e+00 : f32
    %84 = vector.broadcast %cst_25 : f32 to vector<1x128xf32>
    %85 = arith.addf %84, %83 : vector<1x128xf32>
    %86 = arith.divf %84, %85 : vector<1x128xf32>
    %87 = vector.extract_strided_slice %5 {offsets = [2, 256], sizes = [1, 128], strides = [1, 1]} : vector<8x384xf32> to vector<1x128xf32>
    %88 = vector.extract_strided_slice %70 {offsets = [0, 256], sizes = [1, 128], strides = [1, 1]} : vector<1x384xf32> to vector<1x128xf32>
    %89 = arith.addf %88, %6 : vector<1x128xf32>
    %90 = arith.mulf %78, %89 : vector<1x128xf32>
    %91 = arith.addf %87, %90 : vector<1x128xf32>
    %92 = math.tanh %91 : vector<1x128xf32>
    %cst_26 = arith.constant 1.000000e+00 : f32
    %93 = vector.broadcast %cst_26 : f32 to vector<1x128xf32>
    %94 = arith.subf %93, %86 : vector<1x128xf32>
    %95 = arith.mulf %94, %92 : vector<1x128xf32>
    %96 = arith.mulf %86, %67 : vector<1x128xf32>
    %97 = arith.addf %95, %96 : vector<1x128xf32>
    %98 = arith.truncf %97 : vector<1x128xf32> to vector<1x128xbf16>
    %c0_27 = arith.constant 0 : index
    %c0_28 = arith.constant 0 : index
    %99 = vector.load %arg4[%c0_27, %c0_28] : memref<128x384xbf16, #tpu.memory_space<vmem>>, vector<128x384xbf16>
    %cst_29 = arith.constant dense<0.000000e+00> : vector<1x384xf32>
    %100 = tpu.matmul %98, %99, %cst_29 {dimension_numbers = #tpu.dot_dimension_numbers<[1], [0], [0], [1], [0, 0, 1, 1], [], []>} : vector<1x128xbf16>, vector<128x384xbf16>, vector<1x384xf32> -> vector<1x384xf32>
    %101 = vector.extract_strided_slice %5 {offsets = [3, 0], sizes = [1, 128], strides = [1, 1]} : vector<8x384xf32> to vector<1x128xf32>
    %102 = vector.extract_strided_slice %100 {offsets = [0, 0], sizes = [1, 128], strides = [1, 1]} : vector<1x384xf32> to vector<1x128xf32>
    %103 = arith.addf %101, %102 : vector<1x128xf32>
    %104 = arith.negf %103 : vector<1x128xf32>
    %105 = math.exp %104 : vector<1x128xf32>
    %cst_30 = arith.constant 1.000000e+00 : f32
    %106 = vector.broadcast %cst_30 : f32 to vector<1x128xf32>
    %107 = arith.addf %106, %105 : vector<1x128xf32>
    %108 = arith.divf %106, %107 : vector<1x128xf32>
    %109 = vector.extract_strided_slice %5 {offsets = [3, 128], sizes = [1, 128], strides = [1, 1]} : vector<8x384xf32> to vector<1x128xf32>
    %110 = vector.extract_strided_slice %100 {offsets = [0, 128], sizes = [1, 128], strides = [1, 1]} : vector<1x384xf32> to vector<1x128xf32>
    %111 = arith.addf %109, %110 : vector<1x128xf32>
    %112 = arith.negf %111 : vector<1x128xf32>
    %113 = math.exp %112 : vector<1x128xf32>
    %cst_31 = arith.constant 1.000000e+00 : f32
    %114 = vector.broadcast %cst_31 : f32 to vector<1x128xf32>
    %115 = arith.addf %114, %113 : vector<1x128xf32>
    %116 = arith.divf %114, %115 : vector<1x128xf32>
    %117 = vector.extract_strided_slice %5 {offsets = [3, 256], sizes = [1, 128], strides = [1, 1]} : vector<8x384xf32> to vector<1x128xf32>
    %118 = vector.extract_strided_slice %100 {offsets = [0, 256], sizes = [1, 128], strides = [1, 1]} : vector<1x384xf32> to vector<1x128xf32>
    %119 = arith.addf %118, %6 : vector<1x128xf32>
    %120 = arith.mulf %108, %119 : vector<1x128xf32>
    %121 = arith.addf %117, %120 : vector<1x128xf32>
    %122 = math.tanh %121 : vector<1x128xf32>
    %cst_32 = arith.constant 1.000000e+00 : f32
    %123 = vector.broadcast %cst_32 : f32 to vector<1x128xf32>
    %124 = arith.subf %123, %116 : vector<1x128xf32>
    %125 = arith.mulf %124, %122 : vector<1x128xf32>
    %126 = arith.mulf %116, %97 : vector<1x128xf32>
    %127 = arith.addf %125, %126 : vector<1x128xf32>
    %128 = arith.truncf %127 : vector<1x128xf32> to vector<1x128xbf16>
    %c0_33 = arith.constant 0 : index
    %c0_34 = arith.constant 0 : index
    %129 = vector.load %arg4[%c0_33, %c0_34] : memref<128x384xbf16, #tpu.memory_space<vmem>>, vector<128x384xbf16>
    %cst_35 = arith.constant dense<0.000000e+00> : vector<1x384xf32>
    %130 = tpu.matmul %128, %129, %cst_35 {dimension_numbers = #tpu.dot_dimension_numbers<[1], [0], [0], [1], [0, 0, 1, 1], [], []>} : vector<1x128xbf16>, vector<128x384xbf16>, vector<1x384xf32> -> vector<1x384xf32>
    %131 = vector.extract_strided_slice %5 {offsets = [4, 0], sizes = [1, 128], strides = [1, 1]} : vector<8x384xf32> to vector<1x128xf32>
    %132 = vector.extract_strided_slice %130 {offsets = [0, 0], sizes = [1, 128], strides = [1, 1]} : vector<1x384xf32> to vector<1x128xf32>
    %133 = arith.addf %131, %132 : vector<1x128xf32>
    %134 = arith.negf %133 : vector<1x128xf32>
    %135 = math.exp %134 : vector<1x128xf32>
    %cst_36 = arith.constant 1.000000e+00 : f32
    %136 = vector.broadcast %cst_36 : f32 to vector<1x128xf32>
    %137 = arith.addf %136, %135 : vector<1x128xf32>
    %138 = arith.divf %136, %137 : vector<1x128xf32>
    %139 = vector.extract_strided_slice %5 {offsets = [4, 128], sizes = [1, 128], strides = [1, 1]} : vector<8x384xf32> to vector<1x128xf32>
    %140 = vector.extract_strided_slice %130 {offsets = [0, 128], sizes = [1, 128], strides = [1, 1]} : vector<1x384xf32> to vector<1x128xf32>
    %141 = arith.addf %139, %140 : vector<1x128xf32>
    %142 = arith.negf %141 : vector<1x128xf32>
    %143 = math.exp %142 : vector<1x128xf32>
    %cst_37 = arith.constant 1.000000e+00 : f32
    %144 = vector.broadcast %cst_37 : f32 to vector<1x128xf32>
    %145 = arith.addf %144, %143 : vector<1x128xf32>
    %146 = arith.divf %144, %145 : vector<1x128xf32>
    %147 = vector.extract_strided_slice %5 {offsets = [4, 256], sizes = [1, 128], strides = [1, 1]} : vector<8x384xf32> to vector<1x128xf32>
    %148 = vector.extract_strided_slice %130 {offsets = [0, 256], sizes = [1, 128], strides = [1, 1]} : vector<1x384xf32> to vector<1x128xf32>
    %149 = arith.addf %148, %6 : vector<1x128xf32>
    %150 = arith.mulf %138, %149 : vector<1x128xf32>
    %151 = arith.addf %147, %150 : vector<1x128xf32>
    %152 = math.tanh %151 : vector<1x128xf32>
    %cst_38 = arith.constant 1.000000e+00 : f32
    %153 = vector.broadcast %cst_38 : f32 to vector<1x128xf32>
    %154 = arith.subf %153, %146 : vector<1x128xf32>
    %155 = arith.mulf %154, %152 : vector<1x128xf32>
    %156 = arith.mulf %146, %127 : vector<1x128xf32>
    %157 = arith.addf %155, %156 : vector<1x128xf32>
    %158 = arith.truncf %157 : vector<1x128xf32> to vector<1x128xbf16>
    %c0_39 = arith.constant 0 : index
    %c0_40 = arith.constant 0 : index
    %159 = vector.load %arg4[%c0_39, %c0_40] : memref<128x384xbf16, #tpu.memory_space<vmem>>, vector<128x384xbf16>
    %cst_41 = arith.constant dense<0.000000e+00> : vector<1x384xf32>
    %160 = tpu.matmul %158, %159, %cst_41 {dimension_numbers = #tpu.dot_dimension_numbers<[1], [0], [0], [1], [0, 0, 1, 1], [], []>} : vector<1x128xbf16>, vector<128x384xbf16>, vector<1x384xf32> -> vector<1x384xf32>
    %161 = vector.extract_strided_slice %5 {offsets = [5, 0], sizes = [1, 128], strides = [1, 1]} : vector<8x384xf32> to vector<1x128xf32>
    %162 = vector.extract_strided_slice %160 {offsets = [0, 0], sizes = [1, 128], strides = [1, 1]} : vector<1x384xf32> to vector<1x128xf32>
    %163 = arith.addf %161, %162 : vector<1x128xf32>
    %164 = arith.negf %163 : vector<1x128xf32>
    %165 = math.exp %164 : vector<1x128xf32>
    %cst_42 = arith.constant 1.000000e+00 : f32
    %166 = vector.broadcast %cst_42 : f32 to vector<1x128xf32>
    %167 = arith.addf %166, %165 : vector<1x128xf32>
    %168 = arith.divf %166, %167 : vector<1x128xf32>
    %169 = vector.extract_strided_slice %5 {offsets = [5, 128], sizes = [1, 128], strides = [1, 1]} : vector<8x384xf32> to vector<1x128xf32>
    %170 = vector.extract_strided_slice %160 {offsets = [0, 128], sizes = [1, 128], strides = [1, 1]} : vector<1x384xf32> to vector<1x128xf32>
    %171 = arith.addf %169, %170 : vector<1x128xf32>
    %172 = arith.negf %171 : vector<1x128xf32>
    %173 = math.exp %172 : vector<1x128xf32>
    %cst_43 = arith.constant 1.000000e+00 : f32
    %174 = vector.broadcast %cst_43 : f32 to vector<1x128xf32>
    %175 = arith.addf %174, %173 : vector<1x128xf32>
    %176 = arith.divf %174, %175 : vector<1x128xf32>
    %177 = vector.extract_strided_slice %5 {offsets = [5, 256], sizes = [1, 128], strides = [1, 1]} : vector<8x384xf32> to vector<1x128xf32>
    %178 = vector.extract_strided_slice %160 {offsets = [0, 256], sizes = [1, 128], strides = [1, 1]} : vector<1x384xf32> to vector<1x128xf32>
    %179 = arith.addf %178, %6 : vector<1x128xf32>
    %180 = arith.mulf %168, %179 : vector<1x128xf32>
    %181 = arith.addf %177, %180 : vector<1x128xf32>
    %182 = math.tanh %181 : vector<1x128xf32>
    %cst_44 = arith.constant 1.000000e+00 : f32
    %183 = vector.broadcast %cst_44 : f32 to vector<1x128xf32>
    %184 = arith.subf %183, %176 : vector<1x128xf32>
    %185 = arith.mulf %184, %182 : vector<1x128xf32>
    %186 = arith.mulf %176, %157 : vector<1x128xf32>
    %187 = arith.addf %185, %186 : vector<1x128xf32>
    %188 = arith.truncf %187 : vector<1x128xf32> to vector<1x128xbf16>
    %c0_45 = arith.constant 0 : index
    %c0_46 = arith.constant 0 : index
    %189 = vector.load %arg4[%c0_45, %c0_46] : memref<128x384xbf16, #tpu.memory_space<vmem>>, vector<128x384xbf16>
    %cst_47 = arith.constant dense<0.000000e+00> : vector<1x384xf32>
    %190 = tpu.matmul %188, %189, %cst_47 {dimension_numbers = #tpu.dot_dimension_numbers<[1], [0], [0], [1], [0, 0, 1, 1], [], []>} : vector<1x128xbf16>, vector<128x384xbf16>, vector<1x384xf32> -> vector<1x384xf32>
    %191 = vector.extract_strided_slice %5 {offsets = [6, 0], sizes = [1, 128], strides = [1, 1]} : vector<8x384xf32> to vector<1x128xf32>
    %192 = vector.extract_strided_slice %190 {offsets = [0, 0], sizes = [1, 128], strides = [1, 1]} : vector<1x384xf32> to vector<1x128xf32>
    %193 = arith.addf %191, %192 : vector<1x128xf32>
    %194 = arith.negf %193 : vector<1x128xf32>
    %195 = math.exp %194 : vector<1x128xf32>
    %cst_48 = arith.constant 1.000000e+00 : f32
    %196 = vector.broadcast %cst_48 : f32 to vector<1x128xf32>
    %197 = arith.addf %196, %195 : vector<1x128xf32>
    %198 = arith.divf %196, %197 : vector<1x128xf32>
    %199 = vector.extract_strided_slice %5 {offsets = [6, 128], sizes = [1, 128], strides = [1, 1]} : vector<8x384xf32> to vector<1x128xf32>
    %200 = vector.extract_strided_slice %190 {offsets = [0, 128], sizes = [1, 128], strides = [1, 1]} : vector<1x384xf32> to vector<1x128xf32>
    %201 = arith.addf %199, %200 : vector<1x128xf32>
    %202 = arith.negf %201 : vector<1x128xf32>
    %203 = math.exp %202 : vector<1x128xf32>
    %cst_49 = arith.constant 1.000000e+00 : f32
    %204 = vector.broadcast %cst_49 : f32 to vector<1x128xf32>
    %205 = arith.addf %204, %203 : vector<1x128xf32>
    %206 = arith.divf %204, %205 : vector<1x128xf32>
    %207 = vector.extract_strided_slice %5 {offsets = [6, 256], sizes = [1, 128], strides = [1, 1]} : vector<8x384xf32> to vector<1x128xf32>
    %208 = vector.extract_strided_slice %190 {offsets = [0, 256], sizes = [1, 128], strides = [1, 1]} : vector<1x384xf32> to vector<1x128xf32>
    %209 = arith.addf %208, %6 : vector<1x128xf32>
    %210 = arith.mulf %198, %209 : vector<1x128xf32>
    %211 = arith.addf %207, %210 : vector<1x128xf32>
    %212 = math.tanh %211 : vector<1x128xf32>
    %cst_50 = arith.constant 1.000000e+00 : f32
    %213 = vector.broadcast %cst_50 : f32 to vector<1x128xf32>
    %214 = arith.subf %213, %206 : vector<1x128xf32>
    %215 = arith.mulf %214, %212 : vector<1x128xf32>
    %216 = arith.mulf %206, %187 : vector<1x128xf32>
    %217 = arith.addf %215, %216 : vector<1x128xf32>
    %218 = arith.truncf %217 : vector<1x128xf32> to vector<1x128xbf16>
    %c0_51 = arith.constant 0 : index
    %c0_52 = arith.constant 0 : index
    %219 = vector.load %arg4[%c0_51, %c0_52] : memref<128x384xbf16, #tpu.memory_space<vmem>>, vector<128x384xbf16>
    %cst_53 = arith.constant dense<0.000000e+00> : vector<1x384xf32>
    %220 = tpu.matmul %218, %219, %cst_53 {dimension_numbers = #tpu.dot_dimension_numbers<[1], [0], [0], [1], [0, 0, 1, 1], [], []>} : vector<1x128xbf16>, vector<128x384xbf16>, vector<1x384xf32> -> vector<1x384xf32>
    %221 = vector.extract_strided_slice %5 {offsets = [7, 0], sizes = [1, 128], strides = [1, 1]} : vector<8x384xf32> to vector<1x128xf32>
    %222 = vector.extract_strided_slice %220 {offsets = [0, 0], sizes = [1, 128], strides = [1, 1]} : vector<1x384xf32> to vector<1x128xf32>
    %223 = arith.addf %221, %222 : vector<1x128xf32>
    %224 = arith.negf %223 : vector<1x128xf32>
    %225 = math.exp %224 : vector<1x128xf32>
    %cst_54 = arith.constant 1.000000e+00 : f32
    %226 = vector.broadcast %cst_54 : f32 to vector<1x128xf32>
    %227 = arith.addf %226, %225 : vector<1x128xf32>
    %228 = arith.divf %226, %227 : vector<1x128xf32>
    %229 = vector.extract_strided_slice %5 {offsets = [7, 128], sizes = [1, 128], strides = [1, 1]} : vector<8x384xf32> to vector<1x128xf32>
    %230 = vector.extract_strided_slice %220 {offsets = [0, 128], sizes = [1, 128], strides = [1, 1]} : vector<1x384xf32> to vector<1x128xf32>
    %231 = arith.addf %229, %230 : vector<1x128xf32>
    %232 = arith.negf %231 : vector<1x128xf32>
    %233 = math.exp %232 : vector<1x128xf32>
    %cst_55 = arith.constant 1.000000e+00 : f32
    %234 = vector.broadcast %cst_55 : f32 to vector<1x128xf32>
    %235 = arith.addf %234, %233 : vector<1x128xf32>
    %236 = arith.divf %234, %235 : vector<1x128xf32>
    %237 = vector.extract_strided_slice %5 {offsets = [7, 256], sizes = [1, 128], strides = [1, 1]} : vector<8x384xf32> to vector<1x128xf32>
    %238 = vector.extract_strided_slice %220 {offsets = [0, 256], sizes = [1, 128], strides = [1, 1]} : vector<1x384xf32> to vector<1x128xf32>
    %239 = arith.addf %238, %6 : vector<1x128xf32>
    %240 = arith.mulf %228, %239 : vector<1x128xf32>
    %241 = arith.addf %237, %240 : vector<1x128xf32>
    %242 = math.tanh %241 : vector<1x128xf32>
    %cst_56 = arith.constant 1.000000e+00 : f32
    %243 = vector.broadcast %cst_56 : f32 to vector<1x128xf32>
    %244 = arith.subf %243, %236 : vector<1x128xf32>
    %245 = arith.mulf %244, %242 : vector<1x128xf32>
    %246 = arith.mulf %236, %217 : vector<1x128xf32>
    %247 = arith.addf %245, %246 : vector<1x128xf32>
    %248 = tpu.concatenate %37, %67, %97, %127, %157, %187, %217, %247 in 0 : vector<1x128xf32>, vector<1x128xf32>, vector<1x128xf32>, vector<1x128xf32>, vector<1x128xf32>, vector<1x128xf32>, vector<1x128xf32>, vector<1x128xf32> -> vector<8x128xf32>
    %c0_57 = arith.constant 0 : index
    %c0_58 = arith.constant 0 : index
    %249 = vector.load %arg6[%c0_57, %c0_58] : memref<8x128xf32, #tpu.memory_space<vmem>>, vector<8x128xf32>
    tpu.vector_store %arg6[%c0_57, %c0_58], %248 {strides = array<i32>} : memref<8x128xf32, #tpu.memory_space<vmem>>, vector<8x128xf32>,
    return
  }
}

</mosaic_0001>

<bundles_post_ra>
// kernel: tpu_custom_call.1
= control target key start
LH: loop header
LB: loop body
LE: loop exit
PB: predicated region body
PF: predicated region fallthrough
CT: control target
= control target key end

     0   :  { %11 = vsyncpa [#allocation3], 0  ;;  %s2566_s0 = inlined_call_operand.hbm [shape: bf16[8,128], index: 0, kind: input, shape index: {}]   ;;  %s2567_s1 = inlined_call_operand.vmem [shape: f32[1,128], index: 1, kind: input, shape index: {}]   ;;  %s2568_s2 = inlined_call_operand.hbm [shape: bf16[128,384], index: 2, kind: input, shape index: {}]   ;;  %s2569_s3 = inlined_call_operand.vmem [shape: f32[1,384], index: 3, kind: input, shape index: {}]   ;;  %s2570_s4 = inlined_call_operand.hbm [shape: bf16[128,384], index: 4, kind: input, shape index: {}]   ;;  %s2571_s5 = inlined_call_operand.vmem [shape: f32[1,128], index: 5, kind: input, shape index: {}]   ;;  %s2572_s6 = inlined_call_operand.hbm [shape: f32[8,128], index: 6, kind: output, shape index: {}]  }
   0x1   :  { %12 = vsyncpa [#allocation6], 0 }
   0x2   :  { %13 = vsyncpa [#allocation4], 0  ;;  %s2047_s21 = smov [#allocation5]   ;;  %s1953_s25 = scalar_lea.hbm %s2568_s2, 3072 }
   0x3   :  { %s31_s22 = sshll.u32 %s2047_s21, 4  ;;  %p1954_p0 = scmp.ne.s32.totalorder %s2568_s2, %s1953_s25  ;;  %s32_s22 = int_to_ptr.vmem [resolvable:$true] %s31_s22 }
   0x4   :  { %p1957_p1 = scmp.lt.u32.totalorder %s1953_s25, %s2568_s2 }
   0x6   :  { %p1959_p2 = pnand %p1957_p1, %p1954_p0 }
   0x8   :  { %1962 = shalt.err (!%p1959_p2)
}
   0x9   :  { %s1963_s30 = scalar_lea.vmem %s32_s22, 3072  ;;  %p1968_p4 = scmp.lt.s32.totalorder %s32_s22, %s32_s22 }
   0xa   :  { %p1964_p3 = scmp.ne.s32.totalorder %s32_s22, %s1963_s30  ;;  %p1969_p5 = scmp.lt.s32.totalorder %s1963_s30, %s1963_s30 }
   0xc   :  { %p1970_p6 = por %p1969_p5, %p1968_p4 }
   0xe   :  { %p1971_p7 = pnand %p1970_p6, %p1964_p3 }
  0x10   :  { %1974 = shalt.err (!%p1971_p7)
}
  0x11   :  { %s2048_s7 = smov 192   ;;  %s2049_s8 = smov 12  }
  0x12   :  { %37 = dma.hbm_to_vmem [thread:$0]  %s2568_s2, 3072, %s32_s22, [#allocation6], %s2048_s7, %s2048_s7, %s2049_s8  }
  0x13   :  { %s2050_s11 = smov [#allocation2]   ;;  %s2051_s13 = smov [#allocation7]  }
  0x14   :  { %s20_s12 = sshll.u32 %s2050_s11, 4  ;;  %s45_s14 = sshll.u32 %s2051_s13, 4  ;;  %s21_s12 = int_to_ptr.vmem [resolvable:$true] %s20_s12  ;;  %s46_s14 = int_to_ptr.vmem [resolvable:$true] %s45_s14 }
  0x15   :  { %s1975_s17 = scalar_lea.hbm %s2566_s0, 64 }
  0x16   :  { %p1976_p8 = scmp.ne.s32.totalorder %s2566_s0, %s1975_s17  ;;  %p1979_p9 = scmp.lt.u32.totalorder %s1975_s17, %s2566_s0 }
  0x18   :  { %p1981_p10 = pnand %p1979_p9, %p1976_p8 }
  0x1a   :  { %1984 = shalt.err (!%p1981_p10)
}
  0x1b   :  { %s1985_s2 = scalar_lea.vmem %s21_s12, 64  ;;  %p1990_p12 = scmp.lt.s32.totalorder %s21_s12, %s21_s12 }
  0x1c   :  { %p1986_p11 = scmp.ne.s32.totalorder %s21_s12, %s1985_s2  ;;  %p1991_p13 = scmp.lt.s32.totalorder %s1985_s2, %s1985_s2 }
  0x1e   :  { %p1992_p0 = por %p1991_p13, %p1990_p12 }
  0x20   :  { %p1993_p1 = pnand %p1992_p0, %p1986_p11 }
  0x22   :  { %1996 = shalt.err (!%p1993_p1)
}
  0x23   :  { %23 = dma.hbm_to_vmem [thread:$0]  %s2566_s0, 64, %s21_s12, [#allocation3]  }
  0x24   :  { %s1997_s26 = scalar_lea.hbm %s2570_s4, 3072 }
  0x25   :  { %p1998_p2 = scmp.ne.s32.totalorder %s2570_s4, %s1997_s26  ;;  %p2001_p3 = scmp.lt.u32.totalorder %s1997_s26, %s2570_s4 }
  0x27   :  { %p2003_p4 = pnand %p2001_p3, %p1998_p2 }
  0x29   :  { %2006 = shalt.err (!%p2003_p4)
}
  0x2a   :  { %s2007_s9 = scalar_lea.vmem %s46_s14, 3072  ;;  %p2012_p6 = scmp.lt.s32.totalorder %s46_s14, %s46_s14 }
  0x2b   :  { %p2008_p5 = scmp.ne.s32.totalorder %s46_s14, %s2007_s9  ;;  %p2013_p7 = scmp.lt.s32.totalorder %s2007_s9, %s2007_s9 }
  0x2d   :  { %p2014_p8 = por %p2013_p7, %p2012_p6 }
  0x2f   :  { %p2015_p9 = pnand %p2014_p8, %p2008_p5 }
  0x31   :  { %2018 = shalt.err (!%p2015_p9)
}
  0x32   :  { %51 = dma.hbm_to_vmem [thread:$0]  %s2570_s4, 3072, %s46_s14, [#allocation6], %s2048_s7, %s2048_s7, %s2049_s8  }
  0x33   :  { %2041 = dma.done.wait [#allocation3], 64  }
  0x34   :  { %2042 = vsyncadd [#allocation3], 4294967232 }
  0x35   :  { %2043 = dma.done.wait [#allocation6], 6144  }
  0x36   :  { %2044 = vsyncadd [#allocation6], 4294961152  ;;  %v2052_v0 = vmov 0.0   ;;  %v2053_v1 = vmov 0   ;;  %vm2054_vm0 = vmmov 0   ;;  %v99_v61 = vlaneseq }
  0x37   :  { %1600 = vmatprep.subr.bf16.mxu1 %v2052_v0  ;;  %274 = vmatprep.mubr.bf16.mxu0 %v2053_v1  ;;  %v1789_v2 = vld [vmem:[#allocation5 + $0x4] ss:$12 sps:$4 sm:$0xff]   ;;  %v1791_v3 = vld [vmem:[#allocation5] ss:$12 sps:$4 sm:$0xff]   ;;  %v1792_v4 = vld [vmem:[#allocation5 + $0x1c] ss:$12 sps:$4 sm:$0xff]  }
  0x38   :  { %1616 = vmatprep.mubr.msk.bf16.mxu1 %vm2054_vm0, %v2052_v0  ;;  %242 = vmatprep.subr.bf16.mxu0 %v1789_v2  ;;  %v1794_v5 = vld [vmem:[#allocation5 + $0x18] ss:$12 sps:$4 sm:$0xff]   ;;  %v1795_v6 = vld [vmem:[#allocation5 + $0x34] ss:$12 sps:$4 sm:$0xff]   ;;  %v1797_v7 = vld [vmem:[#allocation5 + $0x30] ss:$12 sps:$4 sm:$0xff]  }
  0x39   :  { %243 = vmatpush1.bf16.msra.mxu0 %v1791_v3  ;;  %v1798_v8 = vld [vmem:[#allocation5 + $0x4c] ss:$12 sps:$4 sm:$0xff]   ;;  %v1809_v9 = vld [vmem:[#allocation5 + $0x8] ss:$12 sps:$4 sm:$0xff]   ;;  %v1801_v11 = vld [vmem:[#allocation5 + $0x64] ss:$12 sps:$4 sm:$0xff]  }
  0x3a   :  { %244 = vmatprep.subr.bf16.mxu0 %v1792_v4  ;;  %v1800_v10 = vld [vmem:[#allocation5 + $0x48] ss:$12 sps:$4 sm:$0xff]   ;;  %1601 = vmatpush3.bf16.msra.mxu1 %v1809_v9  ;;  %v1813_v12 = vld [vmem:[#allocation5 + $0x20] ss:$12 sps:$4 sm:$0xff]   ;;  %v1815_v14 = vld [vmem:[#allocation5 + $0x38] ss:$12 sps:$4 sm:$0xff]  }
  0x3b   :  { %1602 = vmatprep.subr.bf16.mxu1 %v2052_v0  ;;  %v1803_v13 = vld [vmem:[#allocation5 + $0x60] ss:$12 sps:$4 sm:$0xff]   ;;  %v1804_v15 = vld [vmem:[#allocation5 + $0x7c] ss:$12 sps:$4 sm:$0xff]   ;;  %v1806_v16 = vld [vmem:[#allocation5 + $0x78] ss:$12 sps:$4 sm:$0xff]  }
  0x3c   :  { %v1819_v17 = vld [vmem:[#allocation5 + $0x50] ss:$12 sps:$4 sm:$0xff]   ;;  %v1807_v18 = vld [vmem:[#allocation5 + $0x94] ss:$12 sps:$4 sm:$0xff]   ;;  %v1811_v21 = vld [vmem:[#allocation5 + $0xac] ss:$12 sps:$4 sm:$0xff]  }
  0x3d   :  { %245 = vmatpush1.bf16.msra.mxu0 %v1794_v5  ;;  %v1810_v19 = vld [vmem:[#allocation5 + $0x90] ss:$12 sps:$4 sm:$0xff]   ;;  %v1823_v20 = vld [vmem:[#allocation5 + $0x68] ss:$12 sps:$4 sm:$0xff]   ;;  %v1827_v23 = vld [vmem:[#allocation5 + $0x80] ss:$12 sps:$4 sm:$0xff]  }
  0x3e   :  { %246 = vmatprep.subr.bf16.mxu0 %v1795_v6  ;;  %1603 = vmatpush3.bf16.msra.mxu1 %v1813_v12  ;;  %v1814_v22 = vld [vmem:[#allocation5 + $0xa8] ss:$12 sps:$4 sm:$0xff]   ;;  %v2141_v24 = vld [vmem:[#allocation7 + $0x4] ss:$12 sps:$4 sm:$0xff]   ;;  %v64_v25 = vld [vmem:[#allocation2] sm:$0xf] }
  0x3f   :  { %1604 = vmatprep.subr.bf16.mxu1 %v2052_v0  ;;  %v2144_v26 = vld [vmem:[#allocation7] ss:$12 sps:$4 sm:$0xff]   ;;  %v1831_v27 = vld [vmem:[#allocation5 + $0x98] ss:$12 sps:$4 sm:$0xff]   ;;  %v2147_v28 = vld [vmem:[#allocation7 + $0x1c] ss:$12 sps:$4 sm:$0xff]  }
  0x40   :  { %v2150_v29 = vld [vmem:[#allocation7 + $0x18] ss:$12 sps:$4 sm:$0xff]   ;;  %v1835_v30 = vld [vmem:[#allocation5 + $0xb0] ss:$12 sps:$4 sm:$0xff]   ;;  %v2154_v31 = vld [vmem:[#allocation7 + $0x34] ss:$12 sps:$4 sm:$0xff]  }
  0x41   :  { %247 = vmatpush1.bf16.msra.mxu0 %v1797_v7  ;;  %v2159_v32 = vld [vmem:[#allocation7 + $0x30] ss:$12 sps:$4 sm:$0xff]   ;;  %v2161_v33 = vld [vmem:[#allocation7 + $0x8] ss:$12 sps:$4 sm:$0xff]   ;;  %v2164_v34 = vld [vmem:[#allocation7 + $0x4c] ss:$12 sps:$4 sm:$0xff]  }
  0x42   :  { %248 = vmatprep.subr.bf16.mxu0 %v1798_v8  ;;  %1605 = vmatpush3.bf16.msra.mxu1 %v1815_v14  ;;  %v2168_v35 = vld [vmem:[#allocation7 + $0x48] ss:$12 sps:$4 sm:$0xff]   ;;  %v2171_v36 = vld [vmem:[#allocation7 + $0x20] ss:$12 sps:$4 sm:$0xff]   ;;  %v2174_v37 = vld [vmem:[#allocation7 + $0x64] ss:$12 sps:$4 sm:$0xff]  }
  0x43   :  { %1606 = vmatprep.subr.bf16.mxu1 %v2052_v0  ;;  %v2180_v38 = vld [vmem:[#allocation7 + $0x60] ss:$12 sps:$4 sm:$0xff]   ;;  %v2183_v39 = vld [vmem:[#allocation7 + $0x38] ss:$12 sps:$4 sm:$0xff]   ;;  %v2186_v40 = vld [vmem:[#allocation7 + $0x7c] ss:$12 sps:$4 sm:$0xff]  }
  0x44   :  { %v2190_v41 = vld [vmem:[#allocation7 + $0x78] ss:$12 sps:$4 sm:$0xff]   ;;  %v2193_v42 = vld [vmem:[#allocation7 + $0x50] ss:$12 sps:$4 sm:$0xff]   ;;  %v2196_v43 = vld [vmem:[#allocation7 + $0x94] ss:$12 sps:$4 sm:$0xff]  }
  0x45   :  { %249 = vmatpush1.bf16.msra.mxu0 %v1800_v10  ;;  %v2200_v44 = vld [vmem:[#allocation7 + $0x90] ss:$12 sps:$4 sm:$0xff]   ;;  %v2203_v45 = vld [vmem:[#allocation7 + $0x68] ss:$12 sps:$4 sm:$0xff]   ;;  %v2206_v46 = vld [vmem:[#allocation7 + $0xac] ss:$12 sps:$4 sm:$0xff]  }
  0x46   :  { %250 = vmatprep.subr.bf16.mxu0 %v1801_v11  ;;  %1607 = vmatpush3.bf16.msra.mxu1 %v1819_v17  ;;  %v2210_v47 = vld [vmem:[#allocation7 + $0xa8] ss:$12 sps:$4 sm:$0xff]   ;;  %v2215_v48 = vld [vmem:[%s2567_s1] sm:$0x1]  ;;  %v2218_v49 = vld [vmem:[#allocation7 + $0x80] ss:$12 sps:$4 sm:$0xff]  }
  0x47   :  { %1608 = vmatprep.subr.bf16.mxu1 %v2052_v0  ;;  %v325_v50 = vpack.c.bf16 %v2215_v48, %v2215_v48  ;;  %v2226_v51 = vld [vmem:[#allocation7 + $0x98] ss:$12 sps:$4 sm:$0xff]   ;;  %v2231_v52 = vld [vmem:[#allocation7 + $0xb0] ss:$12 sps:$4 sm:$0xff]   ;;  %v100_v62 = vshrl.u32 %v99_v61, 7  ;;  %vm1424_vm1 = vcmask 1040384  }
  0x48   :  { %v97_v2 = vld [vmem:[%s2569_s3] sm:$0x7]  ;;  %vm1426_vm2 = vcmask 1041408   ;;  %vm1428_vm3 = vcmask 1042432   ;;  %vm1430_vm4 = vcmask 1043456   ;;  %vm1432_vm5 = vcmask 1044480  }
  0x49   :  { %251 = vmatpush1.bf16.msra.mxu0 %v1803_v13  ;;  %v101_v63 = vsub.s32 0, %v100_v62  ;;  %v105_v3 = vsub.s32 1, %v100_v62  ;;  %vm1434_vm6 = vcmask 1045504   ;;  %vm1436_vm7 = vcmask 1046528  }
  0x4a   :  { %252 = vmatprep.subr.bf16.mxu0 %v1804_v15  ;;  %1609 = vmatpush3.bf16.msra.mxu1 %v1823_v20 }
  0x4b   :  { %1610 = vmatprep.subr.bf16.mxu1 %v2052_v0  ;;  %v102_v4 = vrot.slane %v97_v2, %v101_v63  ;;  %v106_v5 = vrot.slane %v97_v2, %v105_v3 }
  0x4d   :  { %253 = vmatpush1.bf16.msra.mxu0 %v1806_v16 }
  0x4e   :  { %254 = vmatprep.subr.bf16.mxu0 %v1807_v18  ;;  %1611 = vmatpush3.bf16.msra.mxu1 %v1827_v23 }
  0x4f   :  { %1612 = vmatprep.subr.bf16.mxu1 %v2052_v0 }
  0x51   :  { %255 = vmatpush1.bf16.msra.mxu0 %v1810_v19 }
  0x52   :  { %256 = vmatprep.subr.bf16.mxu0 %v1811_v21  ;;  %1613 = vmatpush3.bf16.msra.mxu1 %v1831_v27 }
  0x53   :  { %1614 = vmatprep.subr.bf16.mxu1 %v2052_v0 }
  0x55   :  { %257 = vmatpush1.bf16.msra.mxu0 %v1814_v22  ;;  %v109_v22 = vsub.s32 2, %v100_v62 }
  0x56   :  { %486 = vmatprep.subr.bf16.mxu0 %v2141_v24  ;;  %1615 = vmatpush3.bf16.msra.mxu1 %v1835_v30 }
  0x57   :  { %1620 = vmatprep.subr.bf16.mxu1 %v2052_v0  ;;  %v110_v27 = vrot.slane %v97_v2, %v109_v22 }
  0x58   :  { %275 = vmatmul.mubr.bf16.vlgmr.msra.gmra.mrb[0].mxu0 %v64_v25 }
  0x59   :  { %487 = vmatpush1.bf16.msra.mxu0 %v2144_v26  ;;  %518 = vmatprep.mubr.bf16.mxu0 %v2053_v1 }
  0x5a   :  { %488 = vmatprep.subr.bf16.mxu0 %v2147_v28  ;;  %1617 = vmatmul.mubr.bf16.vlgmr.msra.gmra.mrb[0].mxu1 %v64_v25  ;;  %v2283_v25 = vld [vmem:[%s2571_s5] sm:$0x1]  ;;  %s2055_s5 = smov [#allocation8]  }
  0x5b   :  { %1621 = vmatpush3.bf16.msra.mxu1 %v2161_v33  ;;  %1636 = vmatprep.mubr.msk.bf16.mxu1 %vm2054_vm0, %v2052_v0  ;;  %s1445_s12 = sshll.u32 %s2055_s5, 4  ;;  %s1446_s12 = int_to_ptr.vmem [resolvable:$true] %s1445_s12 }
  0x5c   :  { %1622 = vmatprep.subr.bf16.mxu1 %v2052_v0  ;;  %s2019_s13 = scalar_lea.vmem %s1446_s12, 128  ;;  %p2024_p11 = scmp.lt.s32.totalorder %s1446_s12, %s1446_s12 }
  0x5d   :  { %489 = vmatpush1.bf16.msra.mxu0 %v2150_v29  ;;  %p2020_p10 = scmp.ne.s32.totalorder %s1446_s12, %s2019_s13  ;;  %p2025_p12 = scmp.lt.s32.totalorder %s2019_s13, %s2019_s13 }
  0x5e   :  { %490 = vmatprep.subr.bf16.mxu0 %v2154_v31 }
  0x5f   :  { %1623 = vmatpush3.bf16.msra.mxu1 %v2171_v36  ;;  %p2026_p13 = por %p2025_p12, %p2024_p11 }
  0x60   :  { %1624 = vmatprep.subr.bf16.mxu1 %v2052_v0 }
  0x61   :  { %491 = vmatpush1.bf16.msra.mxu0 %v2159_v32  ;;  %p2027_p0 = pnand %p2026_p13, %p2020_p10 }
  0x62   :  { %492 = vmatprep.subr.bf16.mxu0 %v2164_v34 }
  0x63   :  { %1625 = vmatpush3.bf16.msra.mxu1 %v2183_v39 }
  0x64   :  { %1626 = vmatprep.subr.bf16.mxu1 %v2052_v0 }
  0x65   :  { %493 = vmatpush1.bf16.msra.mxu0 %v2168_v35 }
  0x66   :  { %494 = vmatprep.subr.bf16.mxu0 %v2174_v37 }
  0x67   :  { %1627 = vmatpush3.bf16.msra.mxu1 %v2193_v42 }
  0x68   :  { %1628 = vmatprep.subr.bf16.mxu1 %v2052_v0 }
  0x69   :  { %495 = vmatpush1.bf16.msra.mxu0 %v2180_v38 }
  0x6a   :  { %496 = vmatprep.subr.bf16.mxu0 %v2186_v40 }
  0x6b   :  { %1629 = vmatpush3.bf16.msra.mxu1 %v2203_v45 }
  0x6c   :  { %1630 = vmatprep.subr.bf16.mxu1 %v2052_v0 }
  0x6d   :  { %497 = vmatpush1.bf16.msra.mxu0 %v2190_v41 }
  0x6e   :  { %498 = vmatprep.subr.bf16.mxu0 %v2196_v43 }
  0x6f   :  { %1631 = vmatpush3.bf16.msra.mxu1 %v2218_v49 }
  0x70   :  { %1632 = vmatprep.subr.bf16.mxu1 %v2052_v0 }
  0x71   :  { %499 = vmatpush1.bf16.msra.mxu0 %v2200_v44 }
  0x72   :  { %500 = vmatprep.subr.bf16.mxu0 %v2206_v46 }
  0x73   :  { %1633 = vmatpush3.bf16.msra.mxu1 %v2226_v51 }
  0x74   :  { %1634 = vmatprep.subr.bf16.mxu1 %v2052_v0 }
  0x75   :  { %501 = vmatpush1.bf16.msra.mxu0 %v2210_v47 }
  0x76   :  { %590 = vmatprep.subr.bf16.mxu0 %v2141_v24 }
  0x77   :  { %1635 = vmatpush3.bf16.msra.mxu1 %v2231_v52 }
  0x78   :  { %519 = vmatmul.mubr.bf16.vlgmr.msra.gmra.mrb[4].mxu0 %v325_v50  ;;  %1640 = vmatprep.subr.bf16.mxu1 %v2052_v0 }
  0x79   :  { %591 = vmatpush1.bf16.msra.mxu0 %v2144_v26  ;;  %622 = vmatprep.mubr.bf16.mxu0 %v2053_v1 }
  0x7a   :  { %592 = vmatprep.subr.bf16.mxu0 %v2147_v28  ;;  %1637 = vmatmul.mubr.bf16.vlgmr.msra.gmra.mrb[4].mxu1 %v325_v50 }
  0x7b   :  { %1641 = vmatpush3.bf16.msra.mxu1 %v2161_v33  ;;  %1656 = vmatprep.mubr.msk.bf16.mxu1 %vm2054_vm0, %v2052_v0 }
  0x7c   :  { %1642 = vmatprep.subr.bf16.mxu1 %v2052_v0 }
  0x7d   :  { %593 = vmatpush1.bf16.msra.mxu0 %v2150_v29 }
  0x7e   :  { %594 = vmatprep.subr.bf16.mxu0 %v2154_v31 }
  0x7f   :  { %1643 = vmatpush3.bf16.msra.mxu1 %v2171_v36 }
  0x80   :  { %1644 = vmatprep.subr.bf16.mxu1 %v2052_v0 }
  0x81   :  { %595 = vmatpush1.bf16.msra.mxu0 %v2159_v32 }
  0x82   :  { %596 = vmatprep.subr.bf16.mxu0 %v2164_v34 }
  0x83   :  { %1645 = vmatpush3.bf16.msra.mxu1 %v2183_v39 }
  0x84   :  { %1646 = vmatprep.subr.bf16.mxu1 %v2052_v0 }
  0x85   :  { %597 = vmatpush1.bf16.msra.mxu0 %v2168_v35 }
  0x86   :  { %598 = vmatprep.subr.bf16.mxu0 %v2174_v37 }
  0x87   :  { %1647 = vmatpush3.bf16.msra.mxu1 %v2193_v42 }
  0x88   :  { %1648 = vmatprep.subr.bf16.mxu1 %v2052_v0 }
  0x89   :  { %599 = vmatpush1.bf16.msra.mxu0 %v2180_v38 }
  0x8a   :  { %600 = vmatprep.subr.bf16.mxu0 %v2186_v40 }
  0x8b   :  { %1649 = vmatpush3.bf16.msra.mxu1 %v2203_v45 }
  0x8c   :  { %1650 = vmatprep.subr.bf16.mxu1 %v2052_v0 }
  0x8d   :  { %601 = vmatpush1.bf16.msra.mxu0 %v2190_v41 }
  0x8e   :  { %602 = vmatprep.subr.bf16.mxu0 %v2196_v43 }
  0x8f   :  { %1651 = vmatpush3.bf16.msra.mxu1 %v2218_v49 }
  0x90   :  { %1652 = vmatprep.subr.bf16.mxu1 %v2052_v0 }
  0x91   :  { %603 = vmatpush1.bf16.msra.mxu0 %v2200_v44 }
  0x92   :  { %604 = vmatprep.subr.bf16.mxu0 %v2206_v46 }
  0x93   :  { %1653 = vmatpush3.bf16.msra.mxu1 %v2226_v51 }
  0x94   :  { %1654 = vmatprep.subr.bf16.mxu1 %v2052_v0 }
  0x95   :  { %605 = vmatpush1.bf16.msra.mxu0 %v2210_v47 }
  0x96   :  { %710 = vmatprep.subr.bf16.mxu0 %v2141_v24 }
  0x97   :  { %1655 = vmatpush3.bf16.msra.mxu1 %v2231_v52 }
  0x98   :  { %1660 = vmatprep.subr.bf16.mxu1 %v2052_v0 }
 0x12b   :  { %v276_v53 = vpop.f32.mrb[0].mxu0 }
 0x12c   :  { %v278_v54 = vpop.f32.mrb[1].mxu0  ;;  %v2274_v6 = vadd.f32 %v276_v53, %v102_v4 }
 0x12d   :  { %v280_v55 = vpop.f32.mrb[2].mxu0  ;;  %v317_v57 = vpop.f32.mrb[0].mxu1  ;;  %v2277_v10 = vadd.f32 %v278_v54, %v106_v5 }
 0x12e   :  { %v281_v56 = vpop.f32.mrb[3].mxu0  ;;  %v1618_v58 = vpop.f32.mrb[1].mxu1  ;;  %v2286_v54 = vadd.f32 %v317_v57, %v110_v27 }
 0x12f   :  { %v320_v59 = vpop.f32.mrb[2].mxu1 }
 0x130   :  { %v1619_v60 = vpop.f32.mrb[3].mxu1 }
 0x14b   :  { %v520_v7 = vpop.f32.mrb[4].mxu0 }
 0x14c   :  { %v567_v8 = vadd.f32 %v520_v7, %v2274_v6  ;;  %v522_v9 = vpop.f32.mrb[5].mxu0 }
 0x14d   :  { %v524_v11 = vpop.f32.mrb[6].mxu0  ;;  %v574_v14 = vadd.f32 %v522_v9, %v2277_v10  ;;  %v561_v16 = vpop.f32.mrb[4].mxu1 }
 0x14e   :  { %v1503_v12 = vmul.f32 -1.442695, %v567_v8  ;;  %v525_v13 = vpop.f32.mrb[7].mxu0  ;;  %v1638_v17 = vpop.f32.mrb[5].mxu1  ;;  %v581_v50 = vadd.f32 %v561_v16, %v2283_v25 }
 0x14f   :  { %v1504_v15 = vmul.f32 -1.442695, %v574_v14  ;;  %v564_v18 = vpop.f32.mrb[6].mxu1 }
 0x150   :  { %1853 = vpow2.f32 %v1503_v12  ;;  %v1639_v19 = vpop.f32.mrb[7].mxu1 }
 0x151   :  { %1855 = vpow2.f32 %v1504_v15 }
 0x15a   :  { %v1854_v20 = vpop.eup %1853 }
 0x15b   :  { %v571_v21 = vadd.f32 1.0, %v1854_v20  ;;  %v1856_v23 = vpop.eup %1855 }
 0x15c   :  { %v578_v30 = vadd.f32 1.0, %v1856_v23 }
 0x15d   :  { %1857 = vrcp.f32 %v571_v21 }
 0x15e   :  { %1859 = vrcp.f32 %v578_v30 }
 0x167   :  { %v1858_v53 = vpop.eup %1857 }
 0x168   :  { %v582_v55 = vmul.f32 %v1858_v53, %v581_v50  ;;  %v1860_v58 = vpop.eup %1859 }
 0x169   :  { %v585_v59 = vsub.f32 1.0, %v1860_v58  ;;  %v587_v62 = vmul.f32 %v1860_v58, %v2215_v48 }
 0x16a   :  { %v583_v56 = vadd.f32 %v582_v55, %v2286_v54 }
 0x16c   :  { %1861 = vtanh.f32 %v583_v56 }
 0x176   :  { %v1862_v60 = vpop.eup %1861 }
 0x177   :  { %v586_v61 = vmul.f32 %v1862_v60, %v585_v59 }
 0x179   :  { %v2290_v63 = vadd.f32 %v587_v62, %v586_v61 }
 0x17b   :  { %v589_v2 = vpack.c.bf16 %v2290_v63, %v2290_v63  ;;  %v701_v55 = vrot.slane %v2290_v63, 7 }
 0x17d   :  { %623 = vmatmul.mubr.bf16.vlgmr.msra.gmra.mrb[8].mxu0 %v589_v2  ;;  %1657 = vmatmul.mubr.bf16.vlgmr.msra.gmra.mrb[8].mxu1 %v589_v2 }
 0x17e   :  { %711 = vmatpush1.bf16.msra.mxu0 %v2144_v26  ;;  %1661 = vmatpush3.bf16.msra.mxu1 %v2161_v33 }
 0x17f   :  { %712 = vmatprep.subr.bf16.mxu0 %v2147_v28  ;;  %1662 = vmatprep.subr.bf16.mxu1 %v2052_v0 }
 0x180   :  { %742 = vmatprep.mubr.bf16.mxu0 %v2053_v1  ;;  %1676 = vmatprep.mubr.msk.bf16.mxu1 %vm2054_vm0, %v2052_v0 }
 0x182   :  { %713 = vmatpush1.bf16.msra.mxu0 %v2150_v29  ;;  %1663 = vmatpush3.bf16.msra.mxu1 %v2171_v36 }
 0x183   :  { %714 = vmatprep.subr.bf16.mxu0 %v2154_v31  ;;  %1664 = vmatprep.subr.bf16.mxu1 %v2052_v0 }
 0x186   :  { %715 = vmatpush1.bf16.msra.mxu0 %v2159_v32  ;;  %1665 = vmatpush3.bf16.msra.mxu1 %v2183_v39 }
 0x187   :  { %716 = vmatprep.subr.bf16.mxu0 %v2164_v34  ;;  %1666 = vmatprep.subr.bf16.mxu1 %v2052_v0 }
 0x18a   :  { %717 = vmatpush1.bf16.msra.mxu0 %v2168_v35  ;;  %1667 = vmatpush3.bf16.msra.mxu1 %v2193_v42 }
 0x18b   :  { %718 = vmatprep.subr.bf16.mxu0 %v2174_v37  ;;  %1668 = vmatprep.subr.bf16.mxu1 %v2052_v0 }
 0x18e   :  { %719 = vmatpush1.bf16.msra.mxu0 %v2180_v38  ;;  %1669 = vmatpush3.bf16.msra.mxu1 %v2203_v45 }
 0x18f   :  { %720 = vmatprep.subr.bf16.mxu0 %v2186_v40  ;;  %1670 = vmatprep.subr.bf16.mxu1 %v2052_v0 }
 0x192   :  { %721 = vmatpush1.bf16.msra.mxu0 %v2190_v41  ;;  %1671 = vmatpush3.bf16.msra.mxu1 %v2218_v49 }
 0x193   :  { %722 = vmatprep.subr.bf16.mxu0 %v2196_v43  ;;  %1672 = vmatprep.subr.bf16.mxu1 %v2052_v0 }
 0x196   :  { %723 = vmatpush1.bf16.msra.mxu0 %v2200_v44  ;;  %1673 = vmatpush3.bf16.msra.mxu1 %v2226_v51 }
 0x197   :  { %724 = vmatprep.subr.bf16.mxu0 %v2206_v46  ;;  %1674 = vmatprep.subr.bf16.mxu1 %v2052_v0 }
 0x19a   :  { %725 = vmatpush1.bf16.msra.mxu0 %v2210_v47  ;;  %1675 = vmatpush3.bf16.msra.mxu1 %v2231_v52 }
 0x19b   :  { %829 = vmatprep.subr.bf16.mxu0 %v2141_v24  ;;  %1680 = vmatprep.subr.bf16.mxu1 %v2052_v0 }
 0x250   :  { %v624_v48 = vpop.f32.mrb[8].mxu0  ;;  %v665_v57 = vpop.f32.mrb[8].mxu1 }
 0x251   :  { %v672_v3 = vrot.slane %v624_v48, 7  ;;  %v626_v4 = vpop.f32.mrb[9].mxu0  ;;  %v1658_v5 = vpop.f32.mrb[9].mxu1  ;;  %v691_v20 = vadd.f32 %v665_v57, %v2283_v25 }
 0x252   :  { %v682_v7 = vrot.slane %v626_v4, 7  ;;  %v628_v8 = vpop.f32.mrb[10].mxu0  ;;  %v668_v9 = vpop.f32.mrb[10].mxu1 }
 0x253   :  { %v674_v11 = vadd.f32 %v672_v3, %v2274_v6  ;;  %v629_v12 = vpop.f32.mrb[11].mxu0  ;;  %v1659_v13 = vpop.f32.mrb[11].mxu1  ;;  %v693_v22 = vrot.slane %v691_v20, 7 }
 0x254   :  { %v684_v15 = vadd.f32 %v682_v7, %v2277_v10 }
 0x255   :  { %v1505_v14 = vmul.f32 -1.442695, %v674_v11 }
 0x256   :  { %v1506_v16 = vmul.f32 -1.442695, %v684_v15 }
 0x257   :  { %1863 = vpow2.f32 %v1505_v14 }
 0x258   :  { %1865 = vpow2.f32 %v1506_v16 }
 0x261   :  { %v1864_v17 = vpop.eup %1863 }
 0x262   :  { %v678_v18 = vadd.f32 1.0, %v1864_v17  ;;  %v1866_v19 = vpop.eup %1865 }
 0x263   :  { %v688_v21 = vadd.f32 1.0, %v1866_v19 }
 0x264   :  { %1867 = vrcp.f32 %v678_v18 }
 0x265   :  { %1869 = vrcp.f32 %v688_v21 }
 0x26e   :  { %v1868_v23 = vpop.eup %1867 }
 0x26f   :  { %v695_v27 = vmul.f32 %v1868_v23, %v693_v22  ;;  %v1870_v50 = vpop.eup %1869 }
 0x270   :  { %v698_v53 = vsub.f32 1.0, %v1870_v50  ;;  %v703_v59 = vmul.f32 %v1870_v50, %v701_v55 }
 0x271   :  { %v696_v30 = vadd.f32 %v695_v27, %v2286_v54 }
 0x273   :  { %1871 = vtanh.f32 %v696_v30 }
 0x27d   :  { %v1872_v56 = vpop.eup %1871 }
 0x27e   :  { %v699_v58 = vmul.f32 %v1872_v56, %v698_v53 }
 0x280   :  { %v2334_v60 = vadd.f32 %v703_v59, %v699_v58 }
 0x282   :  { %v705_v61 = vpack.c.bf16 %v2334_v60, %v2334_v60  ;;  %v821_v23 = vrot.slane %v2334_v60, 7 }
 0x284   :  { %v707_v62 = vshrl.u32 %v705_v61, 16  ;;  %v1425_v61 = vsel %vm1424_vm1, %v2290_v63, %v2334_v60 }
 0x286   :  { %743 = vmatmul.mubr.bf16.vlgmr.msra.gmra.mrb[12].mxu0 %v707_v62  ;;  %1677 = vmatmul.mubr.bf16.vlgmr.msra.gmra.mrb[12].mxu1 %v707_v62 }
 0x287   :  { %830 = vmatpush1.bf16.msra.mxu0 %v2144_v26  ;;  %1681 = vmatpush3.bf16.msra.mxu1 %v2161_v33 }
 0x288   :  { %831 = vmatprep.subr.bf16.mxu0 %v2147_v28  ;;  %1682 = vmatprep.subr.bf16.mxu1 %v2052_v0 }
 0x289   :  { %861 = vmatprep.mubr.bf16.mxu0 %v2053_v1  ;;  %1696 = vmatprep.mubr.msk.bf16.mxu1 %vm2054_vm0, %v2052_v0 }
 0x28b   :  { %832 = vmatpush1.bf16.msra.mxu0 %v2150_v29  ;;  %1683 = vmatpush3.bf16.msra.mxu1 %v2171_v36 }
 0x28c   :  { %833 = vmatprep.subr.bf16.mxu0 %v2154_v31  ;;  %1684 = vmatprep.subr.bf16.mxu1 %v2052_v0 }
 0x28f   :  { %834 = vmatpush1.bf16.msra.mxu0 %v2159_v32  ;;  %1685 = vmatpush3.bf16.msra.mxu1 %v2183_v39 }
 0x290   :  { %835 = vmatprep.subr.bf16.mxu0 %v2164_v34  ;;  %1686 = vmatprep.subr.bf16.mxu1 %v2052_v0 }
 0x293   :  { %836 = vmatpush1.bf16.msra.mxu0 %v2168_v35  ;;  %1687 = vmatpush3.bf16.msra.mxu1 %v2193_v42 }
 0x294   :  { %837 = vmatprep.subr.bf16.mxu0 %v2174_v37  ;;  %1688 = vmatprep.subr.bf16.mxu1 %v2052_v0 }
 0x297   :  { %838 = vmatpush1.bf16.msra.mxu0 %v2180_v38  ;;  %1689 = vmatpush3.bf16.msra.mxu1 %v2203_v45 }
 0x298   :  { %839 = vmatprep.subr.bf16.mxu0 %v2186_v40  ;;  %1690 = vmatprep.subr.bf16.mxu1 %v2052_v0 }
 0x29b   :  { %840 = vmatpush1.bf16.msra.mxu0 %v2190_v41  ;;  %1691 = vmatpush3.bf16.msra.mxu1 %v2218_v49 }
 0x29c   :  { %841 = vmatprep.subr.bf16.mxu0 %v2196_v43  ;;  %1692 = vmatprep.subr.bf16.mxu1 %v2052_v0 }
 0x29f   :  { %842 = vmatpush1.bf16.msra.mxu0 %v2200_v44  ;;  %1693 = vmatpush3.bf16.msra.mxu1 %v2226_v51 }
 0x2a0   :  { %843 = vmatprep.subr.bf16.mxu0 %v2206_v46  ;;  %1694 = vmatprep.subr.bf16.mxu1 %v2052_v0 }
 0x2a3   :  { %844 = vmatpush1.bf16.msra.mxu0 %v2210_v47  ;;  %1695 = vmatpush3.bf16.msra.mxu1 %v2231_v52 }
 0x2a4   :  { %950 = vmatprep.subr.bf16.mxu0 %v2141_v24  ;;  %1700 = vmatprep.subr.bf16.mxu1 %v2052_v0 }
 0x359   :  { %v744_v2 = vpop.f32.mrb[12].mxu0  ;;  %v785_v48 = vpop.f32.mrb[12].mxu1 }
 0x35a   :  { %v792_v57 = vrot.slane %v744_v2, 6  ;;  %v746_v3 = vpop.f32.mrb[13].mxu0  ;;  %v1678_v4 = vpop.f32.mrb[13].mxu1  ;;  %v811_v20 = vadd.f32 %v785_v48, %v2283_v25 }
 0x35b   :  { %v802_v5 = vrot.slane %v746_v3, 6  ;;  %v748_v7 = vpop.f32.mrb[14].mxu0  ;;  %v788_v8 = vpop.f32.mrb[14].mxu1 }
 0x35c   :  { %v794_v9 = vadd.f32 %v792_v57, %v2274_v6  ;;  %v749_v11 = vpop.f32.mrb[15].mxu0  ;;  %v1679_v12 = vpop.f32.mrb[15].mxu1  ;;  %v813_v21 = vrot.slane %v811_v20, 6 }
 0x35d   :  { %v804_v13 = vadd.f32 %v802_v5, %v2277_v10 }
 0x35e   :  { %v1507_v14 = vmul.f32 -1.442695, %v794_v9 }
 0x35f   :  { %v1508_v15 = vmul.f32 -1.442695, %v804_v13 }
 0x360   :  { %1873 = vpow2.f32 %v1507_v14 }
 0x361   :  { %1875 = vpow2.f32 %v1508_v15 }
 0x36a   :  { %v1874_v16 = vpop.eup %1873 }
 0x36b   :  { %v1876_v17 = vpop.eup %1875  ;;  %v798_v18 = vadd.f32 1.0, %v1874_v16 }
 0x36c   :  { %v808_v19 = vadd.f32 1.0, %v1876_v17 }
 0x36d   :  { %1877 = vrcp.f32 %v798_v18 }
 0x36e   :  { %1879 = vrcp.f32 %v808_v19 }
 0x377   :  { %v1878_v22 = vpop.eup %1877 }
 0x378   :  { %v1880_v27 = vpop.eup %1879  ;;  %v815_v30 = vmul.f32 %v1878_v22, %v813_v21 }
 0x379   :  { %v823_v50 = vmul.f32 %v1880_v27, %v821_v23  ;;  %v818_v55 = vsub.f32 1.0, %v1880_v27 }
 0x37a   :  { %v816_v53 = vadd.f32 %v815_v30, %v2286_v54 }
 0x37c   :  { %1881 = vtanh.f32 %v816_v53 }
 0x386   :  { %v1882_v56 = vpop.eup %1881 }
 0x387   :  { %v819_v58 = vmul.f32 %v1882_v56, %v818_v55 }
 0x389   :  { %v2378_v59 = vadd.f32 %v823_v50, %v819_v58 }
 0x38b   :  { %v825_v62 = vpack.c.bf16 %v2378_v59, %v2378_v59  ;;  %v2385_v2 = vsel %vm1426_vm2, %v1425_v61, %v2378_v59  ;;  %v940_v23 = vrot.slane %v2378_v59, 7 }
 0x38d   :  { %v827_v48 = vrot.slane %v825_v62, 1 }
 0x38f   :  { %862 = vmatmul.mubr.bf16.vlgmr.msra.gmra.mrb[16].mxu0 %v827_v48  ;;  %1697 = vmatmul.mubr.bf16.vlgmr.msra.gmra.mrb[16].mxu1 %v827_v48 }
 0x390   :  { %951 = vmatpush1.bf16.msra.mxu0 %v2144_v26  ;;  %1701 = vmatpush3.bf16.msra.mxu1 %v2161_v33 }
 0x391   :  { %952 = vmatprep.subr.bf16.mxu0 %v2147_v28  ;;  %1702 = vmatprep.subr.bf16.mxu1 %v2052_v0 }
 0x392   :  { %982 = vmatprep.mubr.bf16.mxu0 %v2053_v1  ;;  %1716 = vmatprep.mubr.msk.bf16.mxu1 %vm2054_vm0, %v2052_v0 }
 0x394   :  { %953 = vmatpush1.bf16.msra.mxu0 %v2150_v29  ;;  %1703 = vmatpush3.bf16.msra.mxu1 %v2171_v36 }
 0x395   :  { %954 = vmatprep.subr.bf16.mxu0 %v2154_v31  ;;  %1704 = vmatprep.subr.bf16.mxu1 %v2052_v0 }
 0x398   :  { %955 = vmatpush1.bf16.msra.mxu0 %v2159_v32  ;;  %1705 = vmatpush3.bf16.msra.mxu1 %v2183_v39 }
 0x399   :  { %956 = vmatprep.subr.bf16.mxu0 %v2164_v34  ;;  %1706 = vmatprep.subr.bf16.mxu1 %v2052_v0 }
 0x39c   :  { %957 = vmatpush1.bf16.msra.mxu0 %v2168_v35  ;;  %1707 = vmatpush3.bf16.msra.mxu1 %v2193_v42 }
 0x39d   :  { %958 = vmatprep.subr.bf16.mxu0 %v2174_v37  ;;  %1708 = vmatprep.subr.bf16.mxu1 %v2052_v0 }
 0x3a0   :  { %959 = vmatpush1.bf16.msra.mxu0 %v2180_v38  ;;  %1709 = vmatpush3.bf16.msra.mxu1 %v2203_v45 }
 0x3a1   :  { %960 = vmatprep.subr.bf16.mxu0 %v2186_v40  ;;  %1710 = vmatprep.subr.bf16.mxu1 %v2052_v0 }
 0x3a4   :  { %961 = vmatpush1.bf16.msra.mxu0 %v2190_v41  ;;  %1711 = vmatpush3.bf16.msra.mxu1 %v2218_v49 }
 0x3a5   :  { %962 = vmatprep.subr.bf16.mxu0 %v2196_v43  ;;  %1712 = vmatprep.subr.bf16.mxu1 %v2052_v0 }
 0x3a8   :  { %963 = vmatpush1.bf16.msra.mxu0 %v2200_v44  ;;  %1713 = vmatpush3.bf16.msra.mxu1 %v2226_v51 }
 0x3a9   :  { %964 = vmatprep.subr.bf16.mxu0 %v2206_v46  ;;  %1714 = vmatprep.subr.bf16.mxu1 %v2052_v0 }
 0x3ac   :  { %965 = vmatpush1.bf16.msra.mxu0 %v2210_v47  ;;  %1715 = vmatpush3.bf16.msra.mxu1 %v2231_v52 }
 0x3ad   :  { %1069 = vmatprep.subr.bf16.mxu0 %v2141_v24  ;;  %1720 = vmatprep.subr.bf16.mxu1 %v2052_v0 }
 0x462   :  { %v863_v63 = vpop.f32.mrb[16].mxu0  ;;  %v904_v60 = vpop.f32.mrb[16].mxu1 }
 0x463   :  { %v911_v57 = vrot.slane %v863_v63, 5  ;;  %v865_v3 = vpop.f32.mrb[17].mxu0  ;;  %v1698_v4 = vpop.f32.mrb[17].mxu1  ;;  %v930_v20 = vadd.f32 %v904_v60, %v2283_v25 }
 0x464   :  { %v921_v5 = vrot.slane %v865_v3, 5  ;;  %v867_v7 = vpop.f32.mrb[18].mxu0  ;;  %v907_v8 = vpop.f32.mrb[18].mxu1 }
 0x465   :  { %v913_v9 = vadd.f32 %v911_v57, %v2274_v6  ;;  %v868_v11 = vpop.f32.mrb[19].mxu0  ;;  %v1699_v12 = vpop.f32.mrb[19].mxu1  ;;  %v932_v21 = vrot.slane %v930_v20, 5 }
 0x466   :  { %v923_v13 = vadd.f32 %v921_v5, %v2277_v10 }
 0x467   :  { %v1509_v14 = vmul.f32 -1.442695, %v913_v9 }
 0x468   :  { %v1510_v15 = vmul.f32 -1.442695, %v923_v13 }
 0x469   :  { %1883 = vpow2.f32 %v1509_v14 }
 0x46a   :  { %1885 = vpow2.f32 %v1510_v15 }
 0x473   :  { %v1884_v16 = vpop.eup %1883 }
 0x474   :  { %v1886_v17 = vpop.eup %1885  ;;  %v917_v18 = vadd.f32 1.0, %v1884_v16 }
 0x475   :  { %v927_v19 = vadd.f32 1.0, %v1886_v17 }
 0x476   :  { %1887 = vrcp.f32 %v917_v18 }
 0x477   :  { %1889 = vrcp.f32 %v927_v19 }
 0x480   :  { %v1888_v22 = vpop.eup %1887 }
 0x481   :  { %v1890_v27 = vpop.eup %1889  ;;  %v934_v30 = vmul.f32 %v1888_v22, %v932_v21 }
 0x482   :  { %v942_v50 = vmul.f32 %v1890_v27, %v940_v23  ;;  %v937_v55 = vsub.f32 1.0, %v1890_v27 }
 0x483   :  { %v935_v53 = vadd.f32 %v934_v30, %v2286_v54 }
 0x485   :  { %1891 = vtanh.f32 %v935_v53 }
 0x48f   :  { %v1892_v56 = vpop.eup %1891 }
 0x490   :  { %v938_v58 = vmul.f32 %v1892_v56, %v937_v55 }
 0x492   :  { %v2427_v61 = vadd.f32 %v942_v50, %v938_v58 }
 0x494   :  { %v944_v62 = vpack.c.bf16 %v2427_v61, %v2427_v61  ;;  %v2433_v48 = vsel %vm1428_vm3, %v2385_v2, %v2427_v61  ;;  %v1061_v22 = vrot.slane %v2427_v61, 7 }
 0x496   :  { %v946_v59 = vshrl.u32 %v944_v62, 16 }
 0x498   :  { %v948_v63 = vrot.slane %v946_v59, 1 }
 0x49a   :  { %983 = vmatmul.mubr.bf16.vlgmr.msra.gmra.mrb[20].mxu0 %v948_v63  ;;  %1717 = vmatmul.mubr.bf16.vlgmr.msra.gmra.mrb[20].mxu1 %v948_v63 }
 0x49b   :  { %1070 = vmatpush1.bf16.msra.mxu0 %v2144_v26  ;;  %1721 = vmatpush3.bf16.msra.mxu1 %v2161_v33 }
 0x49c   :  { %1071 = vmatprep.subr.bf16.mxu0 %v2147_v28  ;;  %1722 = vmatprep.subr.bf16.mxu1 %v2052_v0 }
 0x49d   :  { %1101 = vmatprep.mubr.bf16.mxu0 %v2053_v1  ;;  %1736 = vmatprep.mubr.msk.bf16.mxu1 %vm2054_vm0, %v2052_v0 }
 0x49f   :  { %1072 = vmatpush1.bf16.msra.mxu0 %v2150_v29  ;;  %1723 = vmatpush3.bf16.msra.mxu1 %v2171_v36 }
 0x4a0   :  { %1073 = vmatprep.subr.bf16.mxu0 %v2154_v31  ;;  %1724 = vmatprep.subr.bf16.mxu1 %v2052_v0 }
 0x4a3   :  { %1074 = vmatpush1.bf16.msra.mxu0 %v2159_v32  ;;  %1725 = vmatpush3.bf16.msra.mxu1 %v2183_v39 }
 0x4a4   :  { %1075 = vmatprep.subr.bf16.mxu0 %v2164_v34  ;;  %1726 = vmatprep.subr.bf16.mxu1 %v2052_v0 }
 0x4a7   :  { %1076 = vmatpush1.bf16.msra.mxu0 %v2168_v35  ;;  %1727 = vmatpush3.bf16.msra.mxu1 %v2193_v42 }
 0x4a8   :  { %1077 = vmatprep.subr.bf16.mxu0 %v2174_v37  ;;  %1728 = vmatprep.subr.bf16.mxu1 %v2052_v0 }
 0x4ab   :  { %1078 = vmatpush1.bf16.msra.mxu0 %v2180_v38  ;;  %1729 = vmatpush3.bf16.msra.mxu1 %v2203_v45 }
 0x4ac   :  { %1079 = vmatprep.subr.bf16.mxu0 %v2186_v40  ;;  %1730 = vmatprep.subr.bf16.mxu1 %v2052_v0 }
 0x4af   :  { %1080 = vmatpush1.bf16.msra.mxu0 %v2190_v41  ;;  %1731 = vmatpush3.bf16.msra.mxu1 %v2218_v49 }
 0x4b0   :  { %1081 = vmatprep.subr.bf16.mxu0 %v2196_v43  ;;  %1732 = vmatprep.subr.bf16.mxu1 %v2052_v0 }
 0x4b3   :  { %1082 = vmatpush1.bf16.msra.mxu0 %v2200_v44  ;;  %1733 = vmatpush3.bf16.msra.mxu1 %v2226_v51 }
 0x4b4   :  { %1083 = vmatprep.subr.bf16.mxu0 %v2206_v46  ;;  %1734 = vmatprep.subr.bf16.mxu1 %v2052_v0 }
 0x4b7   :  { %1084 = vmatpush1.bf16.msra.mxu0 %v2210_v47  ;;  %1735 = vmatpush3.bf16.msra.mxu1 %v2231_v52 }
 0x4b8   :  { %1190 = vmatprep.subr.bf16.mxu0 %v2141_v24  ;;  %1740 = vmatprep.subr.bf16.mxu1 %v2052_v0 }
 0x56d   :  { %v984_v2 = vpop.f32.mrb[20].mxu0  ;;  %v1025_v60 = vpop.f32.mrb[20].mxu1 }
 0x56e   :  { %v1032_v57 = vrot.slane %v984_v2, 4  ;;  %v986_v3 = vpop.f32.mrb[21].mxu0  ;;  %v1718_v4 = vpop.f32.mrb[21].mxu1  ;;  %v1051_v19 = vadd.f32 %v1025_v60, %v2283_v25 }
 0x56f   :  { %v1042_v5 = vrot.slane %v986_v3, 4  ;;  %v988_v7 = vpop.f32.mrb[22].mxu0  ;;  %v1028_v8 = vpop.f32.mrb[22].mxu1 }
 0x570   :  { %v1034_v9 = vadd.f32 %v1032_v57, %v2274_v6  ;;  %v989_v11 = vpop.f32.mrb[23].mxu0  ;;  %v1719_v12 = vpop.f32.mrb[23].mxu1  ;;  %v1053_v20 = vrot.slane %v1051_v19, 4  ;;  %v1938_v19 = vld [vmem:[#allocation7 + $0x20] ss:$12 sps:$4 sm:$0xff]  }
 0x571   :  { %v1044_v13 = vadd.f32 %v1042_v5, %v2277_v10 }
 0x572   :  { %v1511_v14 = vmul.f32 -1.442695, %v1034_v9 }
 0x573   :  { %v1512_v15 = vmul.f32 -1.442695, %v1044_v13 }
 0x574   :  { %1893 = vpow2.f32 %v1511_v14 }
 0x575   :  { %1895 = vpow2.f32 %v1512_v15 }
 0x57e   :  { %v1894_v24 = vpop.eup %1893 }
 0x57f   :  { %v1896_v16 = vpop.eup %1895  ;;  %v1038_v17 = vadd.f32 1.0, %v1894_v24  ;;  %v1934_v24 = vld [vmem:[#allocation7] ss:$12 sps:$4 sm:$0xff]  }
 0x580   :  { %v1048_v18 = vadd.f32 1.0, %v1896_v16  ;;  %v1935_v16 = vld [vmem:[#allocation7 + $0x8] ss:$12 sps:$4 sm:$0xff]  }
 0x581   :  { %1897 = vrcp.f32 %v1038_v17  ;;  %v1936_v17 = vld [vmem:[#allocation7 + $0x1c] ss:$12 sps:$4 sm:$0xff]  }
 0x582   :  { %1899 = vrcp.f32 %v1048_v18  ;;  %v1937_v18 = vld [vmem:[#allocation7 + $0x18] ss:$12 sps:$4 sm:$0xff]  }
 0x58b   :  { %v1898_v21 = vpop.eup %1897 }
 0x58c   :  { %v1900_v23 = vpop.eup %1899  ;;  %v1055_v27 = vmul.f32 %v1898_v21, %v1053_v20  ;;  %v1939_v20 = vld [vmem:[#allocation7 + $0x34] ss:$12 sps:$4 sm:$0xff]   ;;  %v1940_v21 = vld [vmem:[#allocation7 + $0x30] ss:$12 sps:$4 sm:$0xff]  }
 0x58d   :  { %v1063_v30 = vmul.f32 %v1900_v23, %v1061_v22  ;;  %v1058_v53 = vsub.f32 1.0, %v1900_v23  ;;  %v1941_v22 = vld [vmem:[#allocation7 + $0x38] ss:$12 sps:$4 sm:$0xff]  }
 0x58e   :  { %v1056_v50 = vadd.f32 %v1055_v27, %v2286_v54  ;;  %v1942_v23 = vld [vmem:[#allocation7 + $0x4c] ss:$12 sps:$4 sm:$0xff]   ;;  %v1944_v27 = vld [vmem:[#allocation7 + $0x50] ss:$12 sps:$4 sm:$0xff]  }
 0x590   :  { %1901 = vtanh.f32 %v1056_v50  ;;  %v1946_v50 = vld [vmem:[#allocation7 + $0x60] ss:$12 sps:$4 sm:$0xff]  }
 0x59a   :  { %v1902_v55 = vpop.eup %1901 }
 0x59b   :  { %v1059_v56 = vmul.f32 %v1902_v55, %v1058_v53  ;;  %v1947_v53 = vld [vmem:[#allocation7 + $0x7c] ss:$12 sps:$4 sm:$0xff]   ;;  %v1948_v55 = vld [vmem:[#allocation7 + $0x78] ss:$12 sps:$4 sm:$0xff]  }
 0x59d   :  { %v2475_v58 = vadd.f32 %v1063_v30, %v1059_v56  ;;  %v1945_v30 = vld [vmem:[#allocation7 + $0x64] ss:$12 sps:$4 sm:$0xff]   ;;  %v1949_v56 = vld [vmem:[#allocation7 + $0x94] ss:$12 sps:$4 sm:$0xff]  }
 0x59f   :  { %v1065_v62 = vpack.c.bf16 %v2475_v58, %v2475_v58  ;;  %v2481_v59 = vsel %vm1430_vm4, %v2433_v48, %v2475_v58  ;;  %v1180_v60 = vrot.slane %v2475_v58, 7  ;;  %v1950_v58 = vld [vmem:[#allocation7 + $0x90] ss:$12 sps:$4 sm:$0xff]  }
 0x5a1   :  { %v1067_v61 = vrot.slane %v1065_v62, 2  ;;  %v1951_v62 = vld [vmem:[#allocation7 + $0xac] ss:$12 sps:$4 sm:$0xff]  }
 0x5a3   :  { %1102 = vmatmul.mubr.bf16.vlgmr.msra.gmra.mrb[24].mxu0 %v1067_v61  ;;  %1737 = vmatmul.mubr.bf16.vlgmr.msra.gmra.mrb[24].mxu1 %v1067_v61 }
 0x5a4   :  { %1191 = vmatpush1.bf16.msra.mxu0 %v2144_v26  ;;  %1741 = vmatpush3.bf16.msra.mxu1 %v2161_v33  ;;  %v1933_v26 = vld [vmem:[#allocation7 + $0x4] ss:$12 sps:$4 sm:$0xff]  }
 0x5a5   :  { %1192 = vmatprep.subr.bf16.mxu0 %v2147_v28  ;;  %1742 = vmatprep.subr.bf16.mxu1 %v2052_v0 }
 0x5a6   :  { %1222 = vmatprep.mubr.bf16.mxu0 %v2053_v1  ;;  %1756 = vmatprep.mubr.msk.bf16.mxu1 %vm2054_vm0, %v2052_v0 }
 0x5a8   :  { %1193 = vmatpush1.bf16.msra.mxu0 %v2150_v29  ;;  %1743 = vmatpush3.bf16.msra.mxu1 %v2171_v36 }
 0x5a9   :  { %1194 = vmatprep.subr.bf16.mxu0 %v2154_v31  ;;  %1744 = vmatprep.subr.bf16.mxu1 %v2052_v0 }
 0x5ac   :  { %1195 = vmatpush1.bf16.msra.mxu0 %v2159_v32  ;;  %1745 = vmatpush3.bf16.msra.mxu1 %v2183_v39 }
 0x5ad   :  { %1196 = vmatprep.subr.bf16.mxu0 %v2164_v34  ;;  %1746 = vmatprep.subr.bf16.mxu1 %v2052_v0 }
 0x5b0   :  { %1197 = vmatpush1.bf16.msra.mxu0 %v2168_v35  ;;  %1747 = vmatpush3.bf16.msra.mxu1 %v2193_v42 }
 0x5b1   :  { %1198 = vmatprep.subr.bf16.mxu0 %v2174_v37  ;;  %1748 = vmatprep.subr.bf16.mxu1 %v2052_v0 }
 0x5b4   :  { %1199 = vmatpush1.bf16.msra.mxu0 %v2180_v38  ;;  %1749 = vmatpush3.bf16.msra.mxu1 %v2203_v45 }
 0x5b5   :  { %1200 = vmatprep.subr.bf16.mxu0 %v2186_v40  ;;  %1750 = vmatprep.subr.bf16.mxu1 %v2052_v0 }
 0x5b8   :  { %1201 = vmatpush1.bf16.msra.mxu0 %v2190_v41  ;;  %1751 = vmatpush3.bf16.msra.mxu1 %v2218_v49 }
 0x5b9   :  { %1202 = vmatprep.subr.bf16.mxu0 %v2196_v43  ;;  %1752 = vmatprep.subr.bf16.mxu1 %v2052_v0 }
 0x5bc   :  { %1203 = vmatpush1.bf16.msra.mxu0 %v2200_v44  ;;  %1753 = vmatpush3.bf16.msra.mxu1 %v2226_v51 }
 0x5bd   :  { %1204 = vmatprep.subr.bf16.mxu0 %v2206_v46  ;;  %1754 = vmatprep.subr.bf16.mxu1 %v2052_v0 }
 0x5c0   :  { %1205 = vmatpush1.bf16.msra.mxu0 %v2210_v47  ;;  %1755 = vmatpush3.bf16.msra.mxu1 %v2231_v52 }
 0x5c1   :  { %1309 = vmatprep.subr.bf16.mxu0 %v1933_v26  ;;  %1760 = vmatprep.subr.bf16.mxu1 %v2052_v0 }
 0x676   :  { %v1103_v28 = vpop.f32.mrb[24].mxu0  ;;  %v1144_v29 = vpop.f32.mrb[24].mxu1 }
 0x677   :  { %v1151_v31 = vrot.slane %v1103_v28, 3  ;;  %v1105_v32 = vpop.f32.mrb[25].mxu0  ;;  %v1738_v33 = vpop.f32.mrb[25].mxu1  ;;  %v1170_v48 = vadd.f32 %v1144_v29, %v2283_v25 }
 0x678   :  { %v1161_v34 = vrot.slane %v1105_v32, 3  ;;  %v1107_v35 = vpop.f32.mrb[26].mxu0  ;;  %v1147_v36 = vpop.f32.mrb[26].mxu1 }
 0x679   :  { %v1153_v37 = vadd.f32 %v1151_v31, %v2274_v6  ;;  %v1108_v38 = vpop.f32.mrb[27].mxu0  ;;  %v1739_v39 = vpop.f32.mrb[27].mxu1  ;;  %v1172_v63 = vrot.slane %v1170_v48, 3 }
 0x67a   :  { %v1163_v40 = vadd.f32 %v1161_v34, %v2277_v10 }
 0x67b   :  { %v1513_v41 = vmul.f32 -1.442695, %v1153_v37 }
 0x67c   :  { %v1514_v42 = vmul.f32 -1.442695, %v1163_v40 }
 0x67d   :  { %1903 = vpow2.f32 %v1513_v41 }
 0x67e   :  { %1905 = vpow2.f32 %v1514_v42 }
 0x687   :  { %v1904_v43 = vpop.eup %1903 }
 0x688   :  { %v1906_v44 = vpop.eup %1905  ;;  %v1157_v46 = vadd.f32 1.0, %v1904_v43 }
 0x689   :  { %v1167_v47 = vadd.f32 1.0, %v1906_v44 }
 0x68a   :  { %1907 = vrcp.f32 %v1157_v46 }
 0x68b   :  { %1909 = vrcp.f32 %v1167_v47 }
 0x694   :  { %v1908_v2 = vpop.eup %1907 }
 0x695   :  { %v1910_v57 = vpop.eup %1909  ;;  %v1174_v3 = vmul.f32 %v1908_v2, %v1172_v63 }
 0x696   :  { %v1182_v4 = vmul.f32 %v1910_v57, %v1180_v60  ;;  %v1177_v7 = vsub.f32 1.0, %v1910_v57 }
 0x697   :  { %v1175_v5 = vadd.f32 %v1174_v3, %v2286_v54 }
 0x699   :  { %1911 = vtanh.f32 %v1175_v5 }
 0x6a3   :  { %v1912_v8 = vpop.eup %1911 }
 0x6a4   :  { %v1178_v9 = vmul.f32 %v1912_v8, %v1177_v7 }
 0x6a6   :  { %v2522_v11 = vadd.f32 %v1182_v4, %v1178_v9 }
 0x6a8   :  { %v1184_v12 = vpack.c.bf16 %v2522_v11, %v2522_v11  ;;  %v2528_v13 = vsel %vm1432_vm5, %v2481_v59, %v2522_v11  ;;  %v1301_v43 = vrot.slane %v2522_v11, 7 }
 0x6aa   :  { %v1186_v14 = vshrl.u32 %v1184_v12, 16 }
 0x6ac   :  { %v1188_v15 = vrot.slane %v1186_v14, 2 }
 0x6ae   :  { %1223 = vmatmul.mubr.bf16.vlgmr.msra.gmra.mrb[28].mxu0 %v1188_v15  ;;  %1757 = vmatmul.mubr.bf16.vlgmr.msra.gmra.mrb[28].mxu1 %v1188_v15 }
 0x6af   :  { %1310 = vmatpush1.bf16.msra.mxu0 %v1934_v24  ;;  %1761 = vmatpush3.bf16.msra.mxu1 %v1935_v16 }
 0x6b0   :  { %1311 = vmatprep.subr.bf16.mxu0 %v1936_v17  ;;  %1762 = vmatprep.subr.bf16.mxu1 %v2052_v0 }
 0x6b1   :  { %1341 = vmatprep.mubr.bf16.mxu0 %v2053_v1  ;;  %1776 = vmatprep.mubr.msk.bf16.mxu1 %vm2054_vm0, %v2052_v0  ;;  %v1943_v1 = vld [vmem:[#allocation7 + $0x48] ss:$12 sps:$4 sm:$0xff]  }
 0x6b3   :  { %1312 = vmatpush1.bf16.msra.mxu0 %v1937_v18  ;;  %1763 = vmatpush3.bf16.msra.mxu1 %v1938_v19 }
 0x6b4   :  { %1313 = vmatprep.subr.bf16.mxu0 %v1939_v20  ;;  %1764 = vmatprep.subr.bf16.mxu1 %v2052_v0 }
 0x6b7   :  { %1314 = vmatpush1.bf16.msra.mxu0 %v1940_v21  ;;  %1765 = vmatpush3.bf16.msra.mxu1 %v1941_v22 }
 0x6b8   :  { %1315 = vmatprep.subr.bf16.mxu0 %v1942_v23  ;;  %1766 = vmatprep.subr.bf16.mxu1 %v2052_v0 }
 0x6bb   :  { %1316 = vmatpush1.bf16.msra.mxu0 %v1943_v1  ;;  %1767 = vmatpush3.bf16.msra.mxu1 %v1944_v27 }
 0x6bc   :  { %1317 = vmatprep.subr.bf16.mxu0 %v1945_v30  ;;  %1768 = vmatprep.subr.bf16.mxu1 %v2052_v0 }
 0x6bf   :  { %1318 = vmatpush1.bf16.msra.mxu0 %v1946_v50  ;;  %1769 = vmatpush3.bf16.msra.mxu1 %v2203_v45  ;;  %v1952_v45 = vld [vmem:[#allocation7 + $0xa8] ss:$12 sps:$4 sm:$0xff]  }
 0x6c0   :  { %1319 = vmatprep.subr.bf16.mxu0 %v1947_v53  ;;  %1770 = vmatprep.subr.bf16.mxu1 %v2052_v0 }
 0x6c3   :  { %1320 = vmatpush1.bf16.msra.mxu0 %v1948_v55  ;;  %1771 = vmatpush3.bf16.msra.mxu1 %v2218_v49 }
 0x6c4   :  { %1321 = vmatprep.subr.bf16.mxu0 %v1949_v56  ;;  %1772 = vmatprep.subr.bf16.mxu1 %v2052_v0 }
 0x6c7   :  { %1322 = vmatpush1.bf16.msra.mxu0 %v1950_v58  ;;  %1773 = vmatpush3.bf16.msra.mxu1 %v2226_v51 }
 0x6c8   :  { %1323 = vmatprep.subr.bf16.mxu0 %v1951_v62  ;;  %1774 = vmatprep.subr.bf16.mxu1 %v2052_v0 }
 0x6cb   :  { %1324 = vmatpush1.bf16.msra.mxu0 %v1952_v45  ;;  %1775 = vmatpush3.bf16.msra.mxu1 %v2231_v52 }
 0x781   :  { %v1224_v59 = vpop.f32.mrb[28].mxu0  ;;  %v1265_v61 = vpop.f32.mrb[28].mxu1 }
 0x782   :  { %v1272_v26 = vrot.slane %v1224_v59, 2  ;;  %v1226_v49 = vpop.f32.mrb[29].mxu0  ;;  %v1758_v28 = vpop.f32.mrb[29].mxu1  ;;  %v1291_v40 = vadd.f32 %v1265_v61, %v2283_v25 }
 0x783   :  { %v1282_v29 = vrot.slane %v1226_v49, 2  ;;  %v1228_v31 = vpop.f32.mrb[30].mxu0  ;;  %v1268_v32 = vpop.f32.mrb[30].mxu1 }
 0x784   :  { %v1274_v33 = vadd.f32 %v1272_v26, %v2274_v6  ;;  %v1229_v34 = vpop.f32.mrb[31].mxu0  ;;  %v1759_v51 = vpop.f32.mrb[31].mxu1  ;;  %v1293_v41 = vrot.slane %v1291_v40, 2 }
 0x785   :  { %v1284_v35 = vadd.f32 %v1282_v29, %v2277_v10 }
 0x786   :  { %v1515_v36 = vmul.f32 -1.442695, %v1274_v33 }
 0x787   :  { %v1516_v0 = vmul.f32 -1.442695, %v1284_v35 }
 0x788   :  { %1913 = vpow2.f32 %v1515_v36 }
 0x789   :  { %1915 = vpow2.f32 %v1516_v0 }
 0x792   :  { %v1914_v37 = vpop.eup %1913 }
 0x793   :  { %v1916_v52 = vpop.eup %1915  ;;  %v1278_v38 = vadd.f32 1.0, %v1914_v37 }
 0x794   :  { %v1288_v39 = vadd.f32 1.0, %v1916_v52 }
 0x795   :  { %1917 = vrcp.f32 %v1278_v38 }
 0x796   :  { %1919 = vrcp.f32 %v1288_v39 }
 0x79f   :  { %v1918_v42 = vpop.eup %1917 }
 0x7a0   :  { %v1920_v44 = vpop.eup %1919  ;;  %v1295_v46 = vmul.f32 %v1918_v42, %v1293_v41 }
 0x7a1   :  { %v1303_v47 = vmul.f32 %v1920_v44, %v1301_v43  ;;  %v1298_v63 = vsub.f32 1.0, %v1920_v44 }
 0x7a2   :  { %v1296_v48 = vadd.f32 %v1295_v46, %v2286_v54 }
 0x7a4   :  { %1921 = vtanh.f32 %v1296_v48 }
 0x7ae   :  { %v1922_v2 = vpop.eup %1921 }
 0x7af   :  { %v1299_v60 = vmul.f32 %v1922_v2, %v1298_v63 }
 0x7b1   :  { %v1304_v57 = vadd.f32 %v1303_v47, %v1299_v60 }
 0x7b3   :  { %v1305_v3 = vpack.c.bf16 %v1304_v57, %v1304_v57  ;;  %v1435_v4 = vsel %vm1434_vm6, %v2528_v13, %v1304_v57  ;;  %v1420_v53 = vrot.slane %v1304_v57, 7 }
 0x7b5   :  { %v1307_v5 = vrot.slane %v1305_v3, 3 }
 0x7b7   :  { %1342 = vmatmul.mubr.bf16.vlgmr.msra.gmra.mrb[32].mxu0 %v1307_v5  ;;  %1777 = vmatmul.mubr.bf16.vlgmr.msra.gmra.mrb[32].mxu1 %v1307_v5 }
 0x88a   :  { %v1343_v7 = vpop.f32.mrb[32].mxu0  ;;  %v1384_v8 = vpop.f32.mrb[32].mxu1 }
 0x88b   :  { %v1391_v9 = vrot.slane %v1343_v7, 1  ;;  %v1345_v11 = vpop.f32.mrb[33].mxu0  ;;  %v1778_v12 = vpop.f32.mrb[33].mxu1  ;;  %v1410_v27 = vadd.f32 %v1384_v8, %v2283_v25 }
 0x88c   :  { %v1401_v14 = vrot.slane %v1345_v11, 1  ;;  %v1347_v15 = vpop.f32.mrb[34].mxu0  ;;  %v1387_v24 = vpop.f32.mrb[34].mxu1 }
 0x88d   :  { %v1393_v16 = vadd.f32 %v1391_v9, %v2274_v6  ;;  %v1348_v17 = vpop.f32.mrb[35].mxu0  ;;  %v1779_v18 = vpop.f32.mrb[35].mxu1  ;;  %v1412_v30 = vrot.slane %v1410_v27, 1 }
 0x88e   :  { %v1403_v19 = vadd.f32 %v1401_v14, %v2277_v10 }
 0x88f   :  { %v1517_v20 = vmul.f32 -1.442695, %v1393_v16 }
 0x890   :  { %v1518_v21 = vmul.f32 -1.442695, %v1403_v19 }
 0x891   :  { %1923 = vpow2.f32 %v1517_v20 }
 0x892   :  { %1925 = vpow2.f32 %v1518_v21 }
 0x89b   :  { %v1924_v13 = vpop.eup %1923 }
 0x89c   :  { %v1926_v22 = vpop.eup %1925  ;;  %v1397_v23 = vadd.f32 1.0, %v1924_v13 }
 0x89d   :  { %v1407_v1 = vadd.f32 1.0, %v1926_v22 }
 0x89e   :  { %1927 = vrcp.f32 %v1397_v23 }
 0x89f   :  { %1929 = vrcp.f32 %v1407_v1 }
 0x8a8   :  { %v1928_v50 = vpop.eup %1927 }
 0x8a9   :  { %v1930_v6 = vpop.eup %1929  ;;  %v1414_v55 = vmul.f32 %v1928_v50, %v1412_v30 }
 0x8aa   :  { %v1422_v56 = vmul.f32 %v1930_v6, %v1420_v53  ;;  %v1417_v58 = vsub.f32 1.0, %v1930_v6 }
 0x8ab   :  { %v1415_v10 = vadd.f32 %v1414_v55, %v2286_v54 }
 0x8ad   :  { %1931 = vtanh.f32 %v1415_v10 }
 0x8b7   :  { %v1932_v62 = vpop.eup %1931 }
 0x8b8   :  { %v1418_v45 = vmul.f32 %v1932_v62, %v1417_v58 }
 0x8ba   :  { %v1423_v59 = vadd.f32 %v1422_v56, %v1418_v45 }
 0x8bc   :  { %v1437_v61 = vsel %vm1436_vm7, %v1435_v4, %v1423_v59 }
 0x8bd   :  { %1438 = vst [vmem:[#allocation8] sm:$0xff] %v1437_v61 }
 0x8be   :  { %2030 = shalt.err (!%p2027_p0)
}
 0x8bf   :  { %s2031_s16 = scalar_lea.hbm %s2572_s6, 128 }
 0x8c0   :  { %p2032_p1 = scmp.ne.s32.totalorder %s2572_s6, %s2031_s16  ;;  %p2035_p2 = scmp.lt.u32.totalorder %s2031_s16, %s2572_s6 }
 0x8c2   :  { %p2037_p3 = pnand %p2035_p2, %p2032_p1 }
 0x8c4   :  { %2040 = shalt.err (!%p2037_p3)
}
 0x8c5   :  { %1448 = dma.vmem_to_hbm [thread:$0]  %s1446_s12, 128, %s2572_s6, [#allocation4]  }
 0x8c6   :  { %2045 = dma.done.wait [#allocation4], 128  }
 0x8c7   :  { %2046 = vsyncadd [#allocation4], 4294967168 }
 0x8c8   :  { %1452 = vsyncpa [#allocation3], 1 }
 0x8c9   :  { %1453 = vsyncpa [#allocation6], 1 }
 0x8ca   :  { %1454 = vsyncpa [#allocation4], 1 }

</bundles_post_ra>
